<compile_context>
chip_gen: v5e
topology: v5e:2x2
jax: 0.10.0
libtpu: 0.0.40
codegen_flags: <defaults>
</compile_context>

<pallas_src>
import math

import jax
import jax.numpy as jnp
from jax.experimental import pallas as pl
from jax.experimental.pallas import tpu as pltpu

# Small demo shapes, lane-aligned (the real module uses D = DFF = 2048, H = 4;
# there TQKV/TFF would be 512).
N = 8          # number of tokens (the batch that attends to itself)
D = 256        # embedding dim
H = 4          # nhead
HD = D // H    # per-head dim
DFF = D        # dim_feedforward == dim in the module
TFF = 128      # feed-forward hidden tile width (streamed W1/W2)
FT = DFF // TFF
TQKV = 256     # fused-QKV weight column tile width (streamed)
QT = (3 * D) // TQKV
S = QT + FT    # inner ("arbitrary") grid length: QKV stream then FF stream
EPS = 1e-5

assert D % 128 == 0 and D % H == 0
assert DFF % TFF == 0 and TFF % 128 == 0
assert (3 * D) % TQKV == 0 and TQKV % 128 == 0


def _layer_norm(x, gamma, beta):
    mu = jnp.mean(x, axis=-1, keepdims=True)
    var = jnp.mean((x - mu) ** 2, axis=-1, keepdims=True)
    return (x - mu) * jax.lax.rsqrt(var + EPS) * gamma + beta


def transformer_kernel(x_ref, wqkv_ref, bqkv_ref, wo_ref, bo_ref,
                       w1_ref, b1_ref, w2_ref, b2_ref,
                       g1_ref, be1_ref, g2_ref, be2_ref,
                       y_ref,
                       qkv_s, x1_s, acc_s):
    s = pl.program_id(1)
    last = pl.num_programs(1) - 1

    # ---- phase A (s < QT): project one streamed [D, TQKV] QKV-weight tile ----
    @pl.when(s < QT)
    def _qkv_tile():
        xb = x_ref[...].astype(jnp.bfloat16)
        tile = jnp.dot(xb, wqkv_ref[...],
                       preferred_element_type=jnp.float32) + bqkv_ref[...]
        col0 = pl.multiple_of(s * TQKV, TQKV)
        qkv_s[:, pl.ds(col0, TQKV)] = tile.astype(jnp.bfloat16)

    # ---- phase B (s == QT-1): attention + first residual/LN (qkv complete) ----
    @pl.when(s == QT - 1)
    def _attention():
        x = x_ref[...].astype(jnp.float32)
        scale = 1.0 / math.sqrt(HD)
        attn = jnp.zeros((N, D), jnp.float32)
        # Static unroll over H=4 heads; q/k/v and the Wo rows are sliced from
        # refs so per-head live ranges stay bounded (no full f32 qkv / Wo value
        # held across the loop).
        for h in range(H):
            lo = h * HD
            qh = qkv_s[:, lo:lo + HD]                       # bf16 [N, HD]
            kh = qkv_s[:, D + lo:D + lo + HD]
            vh = qkv_s[:, 2 * D + lo:2 * D + lo + HD]
            sc = jax.lax.dot_general(qh, kh, (((1,), (1,)), ((), ())),
                                     preferred_element_type=jnp.float32) * scale
            sc = sc - jnp.max(sc, axis=-1, keepdims=True)
            p = jnp.exp(sc)
            p = p * pl.reciprocal(jnp.sum(p, axis=-1, keepdims=True), approx=True)
            head = jnp.dot(p.astype(jnp.bfloat16), vh,
                           preferred_element_type=jnp.float32)
            # Per-head accumulation into the output projection (no concat).
            attn += jnp.dot(head.astype(jnp.bfloat16), wo_ref[lo:lo + HD, :],
                            preferred_element_type=jnp.float32)
        attn += bo_ref[...]
        # TODO(synk): torch training-mode dropout (p=0.5) is identity here.
        x1_s[...] = _layer_norm(x + attn, g1_ref[...], be1_ref[...])
        acc_s[...] = jnp.zeros_like(acc_s)

    # ---- phase C (s >= QT): one streamed feed-forward hidden tile per step ----
    @pl.when(s >= QT)
    def _ff_tile():
        x1b = x1_s[...].astype(jnp.bfloat16)
        hdn = jnp.maximum(
            jnp.dot(x1b, w1_ref[...], preferred_element_type=jnp.float32)
            + b1_ref[...], 0.0)                                     # [N, TFF]
        acc_s[...] += jnp.dot(hdn.astype(jnp.bfloat16), w2_ref[...],
                              preferred_element_type=jnp.float32)   # [N, D]

    # ---- phase D (last step): second residual/LN, single output writeback ----
    @pl.when(s == last)
    def _finalize():
        ff = acc_s[...] + b2_ref[...]
        y_ref[...] = _layer_norm(x1_s[...] + ff,
                                 g2_ref[...], be2_ref[...]).astype(y_ref.dtype)


def _build_specs(use_hints):
    """BlockSpecs; `use_hints` adds pl.Buffered pipeline-depth hints."""
    def bs(shape, index_map, nbuf=None):
        if use_hints and nbuf is not None:
            return pl.BlockSpec(shape, index_map, pipeline_mode=pl.Buffered(nbuf))
        return pl.BlockSpec(shape, index_map)

    qkv_idx = lambda b, s: (0, jnp.minimum(s, QT - 1))          # hold last tile in FF phase
    ff_col = lambda b, s: (0, jnp.maximum(s - QT, 0))           # hold tile 0 in QKV phase
    ff_row = lambda b, s: (jnp.maximum(s - QT, 0), 0)
    const2 = lambda b, s: (0, 0)

    in_specs = [
        pl.BlockSpec((None, N, D), lambda b, s: (b, 0, 0)),      # x (one fetch per group)
        bs((D, TQKV), qkv_idx, 3),                               # fused QKV weight (streamed)
        bs((1, TQKV), qkv_idx),                                  # fused QKV bias tile
        bs((D, D), const2, 1),                                   # out-proj weight (single buffer)
        bs((1, D), const2, 1),                                   # out-proj bias
        bs((D, TFF), ff_col, 3),                                 # W1 tile (streamed)
        bs((1, TFF), ff_col),                                    # b1 tile
        bs((TFF, D), ff_row, 3),                                 # W2 tile (streamed)
        bs((1, D), const2, 1),                                   # b2
        bs((1, D), const2, 1), bs((1, D), const2, 1),            # LN1 gamma/beta
        bs((1, D), const2, 1), bs((1, D), const2, 1),            # LN2 gamma/beta
    ]
    out_specs = pl.BlockSpec((None, N, D), lambda b, s: (b, 0, 0))
    return in_specs, out_specs


def _make_call(batch, use_hints):
    in_specs, out_specs = _build_specs(use_hints)

    flops_per_group = (2 * N * D * 3 * D       # qkv projection
                       + 4 * N * N * D         # scores + p@v over all heads
                       + 2 * N * D * D         # out projection
                       + 4 * N * D * DFF)      # feed-forward
    weight_bytes = 2 * (3 * D * D + D * D + D * DFF + DFF * D)   # bf16 weights
    io_bytes = 2 * (N * D * 4)                                   # x in + y out (f32)
    cost = pl.CostEstimate(flops=batch * flops_per_group,
                           transcendentals=batch * H * N * N,
                           bytes_accessed=batch * (weight_bytes + io_bytes))

    return pl.pallas_call(
        transformer_kernel,
        out_shape=jax.ShapeDtypeStruct((batch, N, D), jnp.float32),
        grid=(batch, S),
        in_specs=in_specs,
        out_specs=out_specs,
        scratch_shapes=[pltpu.VMEM((N, 3 * D), jnp.bfloat16),    # qkv (bf16, bounded live range)
                        pltpu.VMEM((N, D), jnp.float32),         # x1 (post-attention LN)
                        pltpu.VMEM((N, D), jnp.float32)],        # feed-forward accumulator
        compiler_params=pltpu.CompilerParams(
            dimension_semantics=("parallel", "arbitrary"),       # groups || , stream axis = reduction
            vmem_limit_bytes=48 * 1024 * 1024),                  # headroom for v7x (64 MiB/TC)
        cost_estimate=cost,
    )


def _pack_inputs(features_bnd, params):
    """Pack/cast weights in the wrapper: fused bf16 QKV, bf16 matmul weights."""
    wqkv_t = jnp.concatenate(
        [params["wq_t"], params["wk_t"], params["wv_t"]], axis=1).astype(jnp.bfloat16)
    bqkv = jnp.concatenate([params["bq"], params["bk"], params["bv"]], axis=1)
    return (features_bnd, wqkv_t, bqkv,
            params["wo_t"].astype(jnp.bfloat16), params["bo"],
            params["w1_t"].astype(jnp.bfloat16), params["b1"],
            params["w2_t"].astype(jnp.bfloat16), params["b2"],
            params["g1"], params["be1"], params["g2"], params["be2"])


def batchformer_transform(features, params):
    """features: [B, N, D] f32 -> transformed [B, N, D] f32 (independent groups)."""
    batch = features.shape[0]
    inputs = _pack_inputs(features.astype(jnp.float32), params)
    try:
        return jax.block_until_ready(_make_call(batch, use_hints=True)(*inputs))
    except Exception:
        # TODO(synk): pl.Buffered pipeline hints unavailable in this jax build;
        # fall back to default double-buffering.
        return jax.block_until_ready(_make_call(batch, use_hints=False)(*inputs))


def transformer_decorator(feature, params, *, training=True, eval_global=0):
    """feature: [N, D] f32 -> [2N, D] f32 (cat of pass-through + transformed)."""
    if not training and eval_global == 0:
        return feature                       # eval passthrough branch of the module
    y = batchformer_transform(feature[None], params)[0]
    return jnp.concatenate([feature, y.astype(feature.dtype)], axis=0)


# ---------------------------- pure-JAX reference ----------------------------
def reference_transform(x, params):
    """Same bf16-weight / f32-accumulate recipe as the kernel, for one [N, D]."""
    f32, bf = jnp.float32, jnp.bfloat16
    x = x.astype(f32)
    wqkv = jnp.concatenate(
        [params["wq_t"], params["wk_t"], params["wv_t"]], axis=1).astype(bf)
    bqkv = jnp.concatenate([params["bq"], params["bk"], params["bv"]], axis=1)
    qkv = (jnp.dot(x.astype(bf), wqkv, preferred_element_type=f32) + bqkv).astype(bf)
    wo = params["wo_t"].astype(bf)
    scale = 1.0 / math.sqrt(HD)
    attn = jnp.zeros((x.shape[0], D), f32)
    for h in range(H):
        lo = h * HD
        q, k, v = (qkv[:, lo:lo + HD], qkv[:, D + lo:D + lo + HD],
                   qkv[:, 2 * D + lo:2 * D + lo + HD])
        sc = jnp.dot(q, k.T, preferred_element_type=f32) * scale
        p = jax.nn.softmax(sc, axis=-1)
        head = jnp.dot(p.astype(bf), v, preferred_element_type=f32)
        attn += jnp.dot(head.astype(bf), wo[lo:lo + HD, :], preferred_element_type=f32)
    attn += params["bo"]
    x1 = _layer_norm(x + attn, params["g1"], params["be1"])
    hdn = jnp.maximum(jnp.dot(x1.astype(bf), params["w1_t"].astype(bf),
                              preferred_element_type=f32) + params["b1"], 0.0)
    ff = jnp.dot(hdn.astype(bf), params["w2_t"].astype(bf),
                 preferred_element_type=f32) + params["b2"]
    return _layer_norm(x1 + ff, params["g2"], params["be2"])


def init_params(key):
    """Deterministic init mirroring TransformerEncoderLayer(D, 4, D)."""
    ks = jax.random.split(key, 8)
    sdev = 0.05
    nrm = lambda k, shape: jax.random.normal(k, shape, jnp.float32) * sdev
    wq_t, wk_t, wv_t = nrm(ks[0], (D, D)), nrm(ks[1], (D, D)), nrm(ks[2], (D, D))
    bq, bk, bv = nrm(ks[3], (1, D)), nrm(ks[4], (1, D)), nrm(ks[5], (1, D))
    wo_t, bo = nrm(ks[6], (D, D)), jnp.zeros((1, D), jnp.float32)
    kff = jax.random.split(ks[7], 4)
    w1_t, b1 = nrm(kff[0], (D, DFF)), nrm(kff[1], (1, DFF))
    w2_t, b2 = nrm(kff[2], (DFF, D)), nrm(kff[3], (1, D))
    return dict(wq_t=wq_t, wk_t=wk_t, wv_t=wv_t, bq=bq, bk=bk, bv=bv,
                wo_t=wo_t, bo=bo, w1_t=w1_t, b1=b1, w2_t=w2_t, b2=b2,
                g1=jnp.ones((1, D), jnp.float32), be1=jnp.zeros((1, D), jnp.float32),
                g2=jnp.ones((1, D), jnp.float32), be2=jnp.zeros((1, D), jnp.float32))


if __name__ == "__main__":
    key = jax.random.PRNGKey(0)
    k_feat, k_feat2, k_par = jax.random.split(key, 3)
    feature = jax.random.normal(k_feat, (N, D), jnp.float32)
    params = init_params(k_par)

    # Module-semantics path: [N, D] -> [2N, D].
    out = jax.block_until_ready(transformer_decorator(feature, params))
    assert out.shape == (2 * N, D), out.shape
    assert bool(jnp.allclose(out[:N], feature)), "pre_feature passthrough mismatch"
    ref = jax.block_until_ready(reference_transform(feature, params))
    assert bool(jnp.allclose(out[N:], ref, atol=2e-2, rtol=2e-2)), \
        "transformed output mismatch vs reference"

    # Eval branch (training=False, eval_global=0) returns the input unchanged.
    assert bool(jnp.allclose(
        transformer_decorator(feature, params, training=False, eval_global=0), feature))

    # Exercise the "parallel" group axis (amortises the weight stream over
    # several independent [N, D] batches; keeps v7x's second TC busy).
    feats2 = jnp.stack([feature, jax.random.normal(k_feat2, (N, D), jnp.float32)])
    y2 = jax.block_until_ready(batchformer_transform(feats2, params))
    assert y2.shape == (2, N, D)
    assert bool(jnp.allclose(y2[0], out[N:], atol=1e-5, rtol=1e-5)), \
        "batched group 0 mismatch vs single-group result"

    print("KERNEL_OK")
</pallas_src>

<mosaic_0001>
module attributes {stable_mosaic.version = 11 : i64} {
  func.func @transformer_kernel(%arg0: i32, %arg1: i32, %arg2: memref<1x8x256xf32, #tpu.memory_space<vmem>>, %arg3: memref<256x256xbf16, #tpu.memory_space<vmem>>, %arg4: memref<1x256xf32, #tpu.memory_space<vmem>>, %arg5: memref<256x256xbf16, #tpu.memory_space<vmem>>, %arg6: memref<1x256xf32, #tpu.memory_space<vmem>>, %arg7: memref<256x128xbf16, #tpu.memory_space<vmem>>, %arg8: memref<1x128xf32, #tpu.memory_space<vmem>>, %arg9: memref<128x256xbf16, #tpu.memory_space<vmem>>, %arg10: memref<1x256xf32, #tpu.memory_space<vmem>>, %arg11: memref<1x256xf32, #tpu.memory_space<vmem>>, %arg12: memref<1x256xf32, #tpu.memory_space<vmem>>, %arg13: memref<1x256xf32, #tpu.memory_space<vmem>>, %arg14: memref<1x256xf32, #tpu.memory_space<vmem>>, %arg15: memref<1x8x256xf32, #tpu.memory_space<vmem>>, %arg16: memref<8x768xbf16, #tpu.memory_space<vmem>>, %arg17: memref<8x256xf32, #tpu.memory_space<vmem>>, %arg18: memref<8x256xf32, #tpu.memory_space<vmem>>) attributes {dimension_semantics = [#tpu.dimension_semantics<parallel>, #tpu.dimension_semantics<arbitrary>], iteration_bounds = array<i64: 1, 5>, scalar_prefetch = 0 : i64, scratch_operands = 3 : i64, tpu.core_type = #tpu.core_type<tc>, window_params = [{transform_indices = @transform_0, window_bounds = array<i64: 1, 8, 256>}, {transform_indices = @transform_1, window_bounds = array<i64: 256, 256>}, {transform_indices = @transform_2, window_bounds = array<i64: 1, 256>}, {pipeline_mode = #tpu.pipeline_mode<synchronous>, transform_indices = @transform_3, window_bounds = array<i64: 256, 256>}, {pipeline_mode = #tpu.pipeline_mode<synchronous>, transform_indices = @transform_4, window_bounds = array<i64: 1, 256>}, {transform_indices = @transform_5, window_bounds = array<i64: 256, 128>}, {transform_indices = @transform_6, window_bounds = array<i64: 1, 128>}, {transform_indices = @transform_7, window_bounds = array<i64: 128, 256>}, {pipeline_mode = #tpu.pipeline_mode<synchronous>, transform_indices = @transform_8, window_bounds = array<i64: 1, 256>}, {pipeline_mode = #tpu.pipeline_mode<synchronous>, transform_indices = @transform_9, window_bounds = array<i64: 1, 256>}, {pipeline_mode = #tpu.pipeline_mode<synchronous>, transform_indices = @transform_10, window_bounds = array<i64: 1, 256>}, {pipeline_mode = #tpu.pipeline_mode<synchronous>, transform_indices = @transform_11, window_bounds = array<i64: 1, 256>}, {pipeline_mode = #tpu.pipeline_mode<synchronous>, transform_indices = @transform_12, window_bounds = array<i64: 1, 256>}, {transform_indices = @transform_13, window_bounds = array<i64: 1, 8, 256>}]} {
    %c3_i32 = arith.constant 3 : i32
    %0 = arith.cmpi slt, %arg1, %c3_i32 : i32
    %1 = arith.extui %0 : i1 to i32
    %c0_i32 = arith.constant 0 : i32
    %2 = arith.cmpi ne, %1, %c0_i32 : i32
    scf.if %2 {
      %c0 = arith.constant 0 : index
      %c0_4 = arith.constant 0 : index
      %c0_5 = arith.constant 0 : index
      %12 = vector.load %arg2[%c0, %c0_4, %c0_5] : memref<1x8x256xf32, #tpu.memory_space<vmem>>, vector<1x8x256xf32>
      %13 = vector.shape_cast %12 : vector<1x8x256xf32> to vector<8x256xf32>
      %14 = arith.truncf %13 : vector<8x256xf32> to vector<8x256xbf16>
      %c0_6 = arith.constant 0 : index
      %c0_7 = arith.constant 0 : index
      %15 = vector.load %arg3[%c0_6, %c0_7] : memref<256x256xbf16, #tpu.memory_space<vmem>>, vector<256x256xbf16>
      %cst = arith.constant dense<0.000000e+00> : vector<8x256xf32>
      %16 = tpu.matmul %14, %15, %cst {dimension_numbers = #tpu.dot_dimension_numbers<[1], [0], [0], [1], [0, 0, 1, 1], [], []>} : vector<8x256xbf16>, vector<256x256xbf16>, vector<8x256xf32> -> vector<8x256xf32>
      %c0_8 = arith.constant 0 : index
      %c0_9 = arith.constant 0 : index
      %17 = vector.load %arg4[%c0_8, %c0_9] : memref<1x256xf32, #tpu.memory_space<vmem>>, vector<1x256xf32>
      %18 = vector.broadcast %17 : vector<1x256xf32> to vector<8x256xf32>
      %19 = arith.addf %16, %18 : vector<8x256xf32>
      %c256_i32 = arith.constant 256 : i32
      %20 = arith.muli %arg1, %c256_i32 : i32
      %21 = tpu.assume_multiple %20, 256 : i32
      %22 = arith.truncf %19 : vector<8x256xf32> to vector<8x256xbf16>
      %c0_10 = arith.constant 0 : index
      %23 = arith.index_cast %21 : i32 to index
      %24 = vector.load %arg16[%c0_10, %23] : memref<8x768xbf16, #tpu.memory_space<vmem>>, vector<8x256xbf16>
      tpu.vector_store %arg16[%c0_10, %23], %22 {strides = array<i32>} : memref<8x768xbf16, #tpu.memory_space<vmem>>, vector<8x256xbf16>,
    } else {
    }
    %c2_i32 = arith.constant 2 : i32
    %3 = arith.cmpi eq, %arg1, %c2_i32 : i32
    %4 = arith.extui %3 : i1 to i32
    %c0_i32_0 = arith.constant 0 : i32
    %5 = arith.cmpi ne, %4, %c0_i32_0 : i32
    scf.if %5 {
      %c0 = arith.constant 0 : index
      %c0_4 = arith.constant 0 : index
      %c0_5 = arith.constant 0 : index
      %12 = vector.load %arg2[%c0, %c0_4, %c0_5] : memref<1x8x256xf32, #tpu.memory_space<vmem>>, vector<1x8x256xf32>
      %13 = vector.shape_cast %12 : vector<1x8x256xf32> to vector<8x256xf32>
      %cst = arith.constant 0.000000e+00 : f32
      %14 = vector.broadcast %cst : f32 to vector<8x256xf32>
      %c0_6 = arith.constant 0 : index
      %c0_7 = arith.constant 0 : index
      %15 = vector.load %arg16[%c0_6, %c0_7] : memref<8x768xbf16, #tpu.memory_space<vmem>>, vector<8x64xbf16>
      %c0_8 = arith.constant 0 : index
      %c256 = arith.constant 256 : index
      %16 = vector.load %arg16[%c0_8, %c256] : memref<8x768xbf16, #tpu.memory_space<vmem>>, vector<8x64xbf16>
      %c0_9 = arith.constant 0 : index
      %c512 = arith.constant 512 : index
      %17 = vector.load %arg16[%c0_9, %c512] : memref<8x768xbf16, #tpu.memory_space<vmem>>, vector<8x64xbf16>
      %cst_10 = arith.constant dense<0.000000e+00> : vector<8x8xf32>
      %18 = tpu.matmul %15, %16, %cst_10 {dimension_numbers = #tpu.dot_dimension_numbers<[1], [1], [0], [0], [0, 0, 1, 0], [], []>} : vector<8x64xbf16>, vector<8x64xbf16>, vector<8x8xf32> -> vector<8x8xf32>
      %cst_11 = arith.constant 1.250000e-01 : f32
      %19 = vector.broadcast %cst_11 : f32 to vector<8x8xf32>
      %20 = arith.mulf %18, %19 : vector<8x8xf32>
      %cst_12 = arith.constant dense<0xFF800000> : vector<8xf32>
      %21 = vector.multi_reduction <maximumf>, %20, %cst_12 [1] : vector<8x8xf32> to vector<8xf32>
      %22 = vector.shape_cast %21 : vector<8xf32> to vector<8x1xf32>
      %23 = vector.broadcast %22 : vector<8x1xf32> to vector<8x8xf32>
      %24 = arith.subf %20, %23 : vector<8x8xf32>
      %25 = math.exp %24 : vector<8x8xf32>
      %cst_13 = arith.constant dense<0.000000e+00> : vector<8xf32>
      %26 = vector.multi_reduction <add>, %25, %cst_13 [1] : vector<8x8xf32> to vector<8xf32>
      %27 = vector.shape_cast %26 : vector<8xf32> to vector<8x1xf32>
      %28 = tpu.reciprocal %27 {approx = true} : vector<8x1xf32> -> vector<8x1xf32>
      %29 = vector.broadcast %28 : vector<8x1xf32> to vector<8x8xf32>
      %30 = arith.mulf %25, %29 : vector<8x8xf32>
      %31 = arith.truncf %30 : vector<8x8xf32> to vector<8x8xbf16>
      %cst_14 = arith.constant dense<0.000000e+00> : vector<8x64xf32>
      %32 = tpu.matmul %31, %17, %cst_14 {dimension_numbers = #tpu.dot_dimension_numbers<[1], [0], [0], [1], [0, 0, 1, 1], [], []>} : vector<8x8xbf16>, vector<8x64xbf16>, vector<8x64xf32> -> vector<8x64xf32>
      %33 = arith.truncf %32 : vector<8x64xf32> to vector<8x64xbf16>
      %c0_15 = arith.constant 0 : index
      %c0_16 = arith.constant 0 : index
      %34 = vector.load %arg5[%c0_15, %c0_16] : memref<256x256xbf16, #tpu.memory_space<vmem>>, vector<64x256xbf16>
      %cst_17 = arith.constant dense<0.000000e+00> : vector<8x256xf32>
      %35 = tpu.matmul %33, %34, %cst_17 {dimension_numbers = #tpu.dot_dimension_numbers<[1], [0], [0], [1], [0, 0, 1, 1], [], []>} : vector<8x64xbf16>, vector<64x256xbf16>, vector<8x256xf32> -> vector<8x256xf32>
      %36 = arith.addf %14, %35 : vector<8x256xf32>
      %c0_18 = arith.constant 0 : index
      %c64 = arith.constant 64 : index
      %37 = vector.load %arg16[%c0_18, %c64] : memref<8x768xbf16, #tpu.memory_space<vmem>>, vector<8x64xbf16>
      %c0_19 = arith.constant 0 : index
      %c320 = arith.constant 320 : index
      %38 = vector.load %arg16[%c0_19, %c320] : memref<8x768xbf16, #tpu.memory_space<vmem>>, vector<8x64xbf16>
      %c0_20 = arith.constant 0 : index
      %c576 = arith.constant 576 : index
      %39 = vector.load %arg16[%c0_20, %c576] : memref<8x768xbf16, #tpu.memory_space<vmem>>, vector<8x64xbf16>
      %cst_21 = arith.constant dense<0.000000e+00> : vector<8x8xf32>
      %40 = tpu.matmul %37, %38, %cst_21 {dimension_numbers = #tpu.dot_dimension_numbers<[1], [1], [0], [0], [0, 0, 1, 0], [], []>} : vector<8x64xbf16>, vector<8x64xbf16>, vector<8x8xf32> -> vector<8x8xf32>
      %cst_22 = arith.constant 1.250000e-01 : f32
      %41 = vector.broadcast %cst_22 : f32 to vector<8x8xf32>
      %42 = arith.mulf %40, %41 : vector<8x8xf32>
      %cst_23 = arith.constant dense<0xFF800000> : vector<8xf32>
      %43 = vector.multi_reduction <maximumf>, %42, %cst_23 [1] : vector<8x8xf32> to vector<8xf32>
      %44 = vector.shape_cast %43 : vector<8xf32> to vector<8x1xf32>
      %45 = vector.broadcast %44 : vector<8x1xf32> to vector<8x8xf32>
      %46 = arith.subf %42, %45 : vector<8x8xf32>
      %47 = math.exp %46 : vector<8x8xf32>
      %cst_24 = arith.constant dense<0.000000e+00> : vector<8xf32>
      %48 = vector.multi_reduction <add>, %47, %cst_24 [1] : vector<8x8xf32> to vector<8xf32>
      %49 = vector.shape_cast %48 : vector<8xf32> to vector<8x1xf32>
      %50 = tpu.reciprocal %49 {approx = true} : vector<8x1xf32> -> vector<8x1xf32>
      %51 = vector.broadcast %50 : vector<8x1xf32> to vector<8x8xf32>
      %52 = arith.mulf %47, %51 : vector<8x8xf32>
      %53 = arith.truncf %52 : vector<8x8xf32> to vector<8x8xbf16>
      %cst_25 = arith.constant dense<0.000000e+00> : vector<8x64xf32>
      %54 = tpu.matmul %53, %39, %cst_25 {dimension_numbers = #tpu.dot_dimension_numbers<[1], [0], [0], [1], [0, 0, 1, 1], [], []>} : vector<8x8xbf16>, vector<8x64xbf16>, vector<8x64xf32> -> vector<8x64xf32>
      %55 = arith.truncf %54 : vector<8x64xf32> to vector<8x64xbf16>
      %c64_26 = arith.constant 64 : index
      %c0_27 = arith.constant 0 : index
      %56 = vector.load %arg5[%c64_26, %c0_27] : memref<256x256xbf16, #tpu.memory_space<vmem>>, vector<64x256xbf16>
      %cst_28 = arith.constant dense<0.000000e+00> : vector<8x256xf32>
      %57 = tpu.matmul %55, %56, %cst_28 {dimension_numbers = #tpu.dot_dimension_numbers<[1], [0], [0], [1], [0, 0, 1, 1], [], []>} : vector<8x64xbf16>, vector<64x256xbf16>, vector<8x256xf32> -> vector<8x256xf32>
      %58 = arith.addf %36, %57 : vector<8x256xf32>
      %c0_29 = arith.constant 0 : index
      %c128 = arith.constant 128 : index
      %59 = vector.load %arg16[%c0_29, %c128] : memref<8x768xbf16, #tpu.memory_space<vmem>>, vector<8x64xbf16>
      %c0_30 = arith.constant 0 : index
      %c384 = arith.constant 384 : index
      %60 = vector.load %arg16[%c0_30, %c384] : memref<8x768xbf16, #tpu.memory_space<vmem>>, vector<8x64xbf16>
      %c0_31 = arith.constant 0 : index
      %c640 = arith.constant 640 : index
      %61 = vector.load %arg16[%c0_31, %c640] : memref<8x768xbf16, #tpu.memory_space<vmem>>, vector<8x64xbf16>
      %cst_32 = arith.constant dense<0.000000e+00> : vector<8x8xf32>
      %62 = tpu.matmul %59, %60, %cst_32 {dimension_numbers = #tpu.dot_dimension_numbers<[1], [1], [0], [0], [0, 0, 1, 0], [], []>} : vector<8x64xbf16>, vector<8x64xbf16>, vector<8x8xf32> -> vector<8x8xf32>
      %cst_33 = arith.constant 1.250000e-01 : f32
      %63 = vector.broadcast %cst_33 : f32 to vector<8x8xf32>
      %64 = arith.mulf %62, %63 : vector<8x8xf32>
      %cst_34 = arith.constant dense<0xFF800000> : vector<8xf32>
      %65 = vector.multi_reduction <maximumf>, %64, %cst_34 [1] : vector<8x8xf32> to vector<8xf32>
      %66 = vector.shape_cast %65 : vector<8xf32> to vector<8x1xf32>
      %67 = vector.broadcast %66 : vector<8x1xf32> to vector<8x8xf32>
      %68 = arith.subf %64, %67 : vector<8x8xf32>
      %69 = math.exp %68 : vector<8x8xf32>
      %cst_35 = arith.constant dense<0.000000e+00> : vector<8xf32>
      %70 = vector.multi_reduction <add>, %69, %cst_35 [1] : vector<8x8xf32> to vector<8xf32>
      %71 = vector.shape_cast %70 : vector<8xf32> to vector<8x1xf32>
      %72 = tpu.reciprocal %71 {approx = true} : vector<8x1xf32> -> vector<8x1xf32>
      %73 = vector.broadcast %72 : vector<8x1xf32> to vector<8x8xf32>
      %74 = arith.mulf %69, %73 : vector<8x8xf32>
      %75 = arith.truncf %74 : vector<8x8xf32> to vector<8x8xbf16>
      %cst_36 = arith.constant dense<0.000000e+00> : vector<8x64xf32>
      %76 = tpu.matmul %75, %61, %cst_36 {dimension_numbers = #tpu.dot_dimension_numbers<[1], [0], [0], [1], [0, 0, 1, 1], [], []>} : vector<8x8xbf16>, vector<8x64xbf16>, vector<8x64xf32> -> vector<8x64xf32>
      %77 = arith.truncf %76 : vector<8x64xf32> to vector<8x64xbf16>
      %c128_37 = arith.constant 128 : index
      %c0_38 = arith.constant 0 : index
      %78 = vector.load %arg5[%c128_37, %c0_38] : memref<256x256xbf16, #tpu.memory_space<vmem>>, vector<64x256xbf16>
      %cst_39 = arith.constant dense<0.000000e+00> : vector<8x256xf32>
      %79 = tpu.matmul %77, %78, %cst_39 {dimension_numbers = #tpu.dot_dimension_numbers<[1], [0], [0], [1], [0, 0, 1, 1], [], []>} : vector<8x64xbf16>, vector<64x256xbf16>, vector<8x256xf32> -> vector<8x256xf32>
      %80 = arith.addf %58, %79 : vector<8x256xf32>
      %c0_40 = arith.constant 0 : index
      %c192 = arith.constant 192 : index
      %81 = vector.load %arg16[%c0_40, %c192] : memref<8x768xbf16, #tpu.memory_space<vmem>>, vector<8x64xbf16>
      %c0_41 = arith.constant 0 : index
      %c448 = arith.constant 448 : index
      %82 = vector.load %arg16[%c0_41, %c448] : memref<8x768xbf16, #tpu.memory_space<vmem>>, vector<8x64xbf16>
      %c0_42 = arith.constant 0 : index
      %c704 = arith.constant 704 : index
      %83 = vector.load %arg16[%c0_42, %c704] : memref<8x768xbf16, #tpu.memory_space<vmem>>, vector<8x64xbf16>
      %cst_43 = arith.constant dense<0.000000e+00> : vector<8x8xf32>
      %84 = tpu.matmul %81, %82, %cst_43 {dimension_numbers = #tpu.dot_dimension_numbers<[1], [1], [0], [0], [0, 0, 1, 0], [], []>} : vector<8x64xbf16>, vector<8x64xbf16>, vector<8x8xf32> -> vector<8x8xf32>
      %cst_44 = arith.constant 1.250000e-01 : f32
      %85 = vector.broadcast %cst_44 : f32 to vector<8x8xf32>
      %86 = arith.mulf %84, %85 : vector<8x8xf32>
      %cst_45 = arith.constant dense<0xFF800000> : vector<8xf32>
      %87 = vector.multi_reduction <maximumf>, %86, %cst_45 [1] : vector<8x8xf32> to vector<8xf32>
      %88 = vector.shape_cast %87 : vector<8xf32> to vector<8x1xf32>
      %89 = vector.broadcast %88 : vector<8x1xf32> to vector<8x8xf32>
      %90 = arith.subf %86, %89 : vector<8x8xf32>
      %91 = math.exp %90 : vector<8x8xf32>
      %cst_46 = arith.constant dense<0.000000e+00> : vector<8xf32>
      %92 = vector.multi_reduction <add>, %91, %cst_46 [1] : vector<8x8xf32> to vector<8xf32>
      %93 = vector.shape_cast %92 : vector<8xf32> to vector<8x1xf32>
      %94 = tpu.reciprocal %93 {approx = true} : vector<8x1xf32> -> vector<8x1xf32>
      %95 = vector.broadcast %94 : vector<8x1xf32> to vector<8x8xf32>
      %96 = arith.mulf %91, %95 : vector<8x8xf32>
      %97 = arith.truncf %96 : vector<8x8xf32> to vector<8x8xbf16>
      %cst_47 = arith.constant dense<0.000000e+00> : vector<8x64xf32>
      %98 = tpu.matmul %97, %83, %cst_47 {dimension_numbers = #tpu.dot_dimension_numbers<[1], [0], [0], [1], [0, 0, 1, 1], [], []>} : vector<8x8xbf16>, vector<8x64xbf16>, vector<8x64xf32> -> vector<8x64xf32>
      %99 = arith.truncf %98 : vector<8x64xf32> to vector<8x64xbf16>
      %c192_48 = arith.constant 192 : index
      %c0_49 = arith.constant 0 : index
      %100 = vector.load %arg5[%c192_48, %c0_49] : memref<256x256xbf16, #tpu.memory_space<vmem>>, vector<64x256xbf16>
      %cst_50 = arith.constant dense<0.000000e+00> : vector<8x256xf32>
      %101 = tpu.matmul %99, %100, %cst_50 {dimension_numbers = #tpu.dot_dimension_numbers<[1], [0], [0], [1], [0, 0, 1, 1], [], []>} : vector<8x64xbf16>, vector<64x256xbf16>, vector<8x256xf32> -> vector<8x256xf32>
      %102 = arith.addf %80, %101 : vector<8x256xf32>
      %c0_51 = arith.constant 0 : index
      %c0_52 = arith.constant 0 : index
      %103 = vector.load %arg6[%c0_51, %c0_52] : memref<1x256xf32, #tpu.memory_space<vmem>>, vector<1x256xf32>
      %104 = vector.broadcast %103 : vector<1x256xf32> to vector<8x256xf32>
      %105 = arith.addf %102, %104 : vector<8x256xf32>
      %106 = arith.addf %13, %105 : vector<8x256xf32>
      %c0_53 = arith.constant 0 : index
      %c0_54 = arith.constant 0 : index
      %107 = vector.load %arg11[%c0_53, %c0_54] : memref<1x256xf32, #tpu.memory_space<vmem>>, vector<1x256xf32>
      %c0_55 = arith.constant 0 : index
      %c0_56 = arith.constant 0 : index
      %108 = vector.load %arg12[%c0_55, %c0_56] : memref<1x256xf32, #tpu.memory_space<vmem>>, vector<1x256xf32>
      %cst_57 = arith.constant dense<0.000000e+00> : vector<8xf32>
      %109 = vector.multi_reduction <add>, %106, %cst_57 [1] : vector<8x256xf32> to vector<8xf32>
      %110 = vector.shape_cast %109 : vector<8xf32> to vector<8x1xf32>
      %cst_58 = arith.constant 2.560000e+02 : f32
      %111 = vector.broadcast %cst_58 : f32 to vector<8x1xf32>
      %112 = arith.divf %110, %111 : vector<8x1xf32>
      %113 = vector.broadcast %112 : vector<8x1xf32> to vector<8x256xf32>
      %114 = arith.subf %106, %113 : vector<8x256xf32>
      %115 = arith.mulf %114, %114 : vector<8x256xf32>
      %cst_59 = arith.constant dense<0.000000e+00> : vector<8xf32>
      %116 = vector.multi_reduction <add>, %115, %cst_59 [1] : vector<8x256xf32> to vector<8xf32>
      %117 = vector.shape_cast %116 : vector<8xf32> to vector<8x1xf32>
      %cst_60 = arith.constant 2.560000e+02 : f32
      %118 = vector.broadcast %cst_60 : f32 to vector<8x1xf32>
      %119 = arith.divf %117, %118 : vector<8x1xf32>
      %120 = vector.broadcast %112 : vector<8x1xf32> to vector<8x256xf32>
      %121 = arith.subf %106, %120 : vector<8x256xf32>
      %cst_61 = arith.constant 9.99999974E-6 : f32
      %122 = vector.broadcast %cst_61 : f32 to vector<8x1xf32>
      %123 = arith.addf %119, %122 : vector<8x1xf32>
      %124 = math.rsqrt %123 : vector<8x1xf32>
      %125 = vector.broadcast %124 : vector<8x1xf32> to vector<8x256xf32>
      %126 = arith.mulf %121, %125 : vector<8x256xf32>
      %127 = vector.broadcast %107 : vector<1x256xf32> to vector<8x256xf32>
      %128 = arith.mulf %126, %127 : vector<8x256xf32>
      %129 = vector.broadcast %108 : vector<1x256xf32> to vector<8x256xf32>
      %130 = arith.addf %128, %129 : vector<8x256xf32>
      %c0_62 = arith.constant 0 : index
      %c0_63 = arith.constant 0 : index
      %131 = vector.load %arg17[%c0_62, %c0_63] : memref<8x256xf32, #tpu.memory_space<vmem>>, vector<8x256xf32>
      tpu.vector_store %arg17[%c0_62, %c0_63], %130 {strides = array<i32>} : memref<8x256xf32, #tpu.memory_space<vmem>>, vector<8x256xf32>,
      %cst_64 = arith.constant 0.000000e+00 : f32
      %132 = vector.broadcast %cst_64 : f32 to vector<8x256xf32>
      %c0_65 = arith.constant 0 : index
      %c0_66 = arith.constant 0 : index
      %133 = vector.load %arg18[%c0_65, %c0_66] : memref<8x256xf32, #tpu.memory_space<vmem>>, vector<8x256xf32>
      tpu.vector_store %arg18[%c0_65, %c0_66], %132 {strides = array<i32>} : memref<8x256xf32, #tpu.memory_space<vmem>>, vector<8x256xf32>,
    } else {
    }
    %c3_i32_1 = arith.constant 3 : i32
    %6 = arith.cmpi sge, %arg1, %c3_i32_1 : i32
    %7 = arith.extui %6 : i1 to i32
    %c0_i32_2 = arith.constant 0 : i32
    %8 = arith.cmpi ne, %7, %c0_i32_2 : i32
    scf.if %8 {
      %c0 = arith.constant 0 : index
      %c0_4 = arith.constant 0 : index
      %12 = vector.load %arg17[%c0, %c0_4] : memref<8x256xf32, #tpu.memory_space<vmem>>, vector<8x256xf32>
      %13 = arith.truncf %12 : vector<8x256xf32> to vector<8x256xbf16>
      %c0_5 = arith.constant 0 : index
      %c0_6 = arith.constant 0 : index
      %14 = vector.load %arg7[%c0_5, %c0_6] : memref<256x128xbf16, #tpu.memory_space<vmem>>, vector<256x128xbf16>
      %cst = arith.constant dense<0.000000e+00> : vector<8x128xf32>
      %15 = tpu.matmul %13, %14, %cst {dimension_numbers = #tpu.dot_dimension_numbers<[1], [0], [0], [1], [0, 0, 1, 1], [], []>} : vector<8x256xbf16>, vector<256x128xbf16>, vector<8x128xf32> -> vector<8x128xf32>
      %c0_7 = arith.constant 0 : index
      %c0_8 = arith.constant 0 : index
      %16 = vector.load %arg8[%c0_7, %c0_8] : memref<1x128xf32, #tpu.memory_space<vmem>>, vector<1x128xf32>
      %17 = vector.broadcast %16 : vector<1x128xf32> to vector<8x128xf32>
      %18 = arith.addf %15, %17 : vector<8x128xf32>
      %cst_9 = arith.constant 0.000000e+00 : f32
      %19 = vector.broadcast %cst_9 : f32 to vector<8x128xf32>
      %20 = arith.maximumf %18, %19 : vector<8x128xf32>
      %c0_10 = arith.constant 0 : index
      %c0_11 = arith.constant 0 : index
      %21 = vector.load %arg18[%c0_10, %c0_11] : memref<8x256xf32, #tpu.memory_space<vmem>>, vector<8x256xf32>
      %22 = arith.truncf %20 : vector<8x128xf32> to vector<8x128xbf16>
      %c0_12 = arith.constant 0 : index
      %c0_13 = arith.constant 0 : index
      %23 = vector.load %arg9[%c0_12, %c0_13] : memref<128x256xbf16, #tpu.memory_space<vmem>>, vector<128x256xbf16>
      %cst_14 = arith.constant dense<0.000000e+00> : vector<8x256xf32>
      %24 = tpu.matmul %22, %23, %cst_14 {dimension_numbers = #tpu.dot_dimension_numbers<[1], [0], [0], [1], [0, 0, 1, 1], [], []>} : vector<8x128xbf16>, vector<128x256xbf16>, vector<8x256xf32> -> vector<8x256xf32>
      %25 = arith.addf %21, %24 : vector<8x256xf32>
      %c0_15 = arith.constant 0 : index
      %c0_16 = arith.constant 0 : index
      %26 = vector.load %arg18[%c0_15, %c0_16] : memref<8x256xf32, #tpu.memory_space<vmem>>, vector<8x256xf32>
      tpu.vector_store %arg18[%c0_15, %c0_16], %25 {strides = array<i32>} : memref<8x256xf32, #tpu.memory_space<vmem>>, vector<8x256xf32>,
    } else {
    }
    %c4_i32 = arith.constant 4 : i32
    %9 = arith.cmpi eq, %arg1, %c4_i32 : i32
    %10 = arith.extui %9 : i1 to i32
    %c0_i32_3 = arith.constant 0 : i32
    %11 = arith.cmpi ne, %10, %c0_i32_3 : i32
    scf.if %11 {
      %c0 = arith.constant 0 : index
      %c0_4 = arith.constant 0 : index
      %12 = vector.load %arg18[%c0, %c0_4] : memref<8x256xf32, #tpu.memory_space<vmem>>, vector<8x256xf32>
      %c0_5 = arith.constant 0 : index
      %c0_6 = arith.constant 0 : index
      %13 = vector.load %arg10[%c0_5, %c0_6] : memref<1x256xf32, #tpu.memory_space<vmem>>, vector<1x256xf32>
      %14 = vector.broadcast %13 : vector<1x256xf32> to vector<8x256xf32>
      %15 = arith.addf %12, %14 : vector<8x256xf32>
      %c0_7 = arith.constant 0 : index
      %c0_8 = arith.constant 0 : index
      %16 = vector.load %arg17[%c0_7, %c0_8] : memref<8x256xf32, #tpu.memory_space<vmem>>, vector<8x256xf32>
      %17 = arith.addf %16, %15 : vector<8x256xf32>
      %c0_9 = arith.constant 0 : index
      %c0_10 = arith.constant 0 : index
      %18 = vector.load %arg13[%c0_9, %c0_10] : memref<1x256xf32, #tpu.memory_space<vmem>>, vector<1x256xf32>
      %c0_11 = arith.constant 0 : index
      %c0_12 = arith.constant 0 : index
      %19 = vector.load %arg14[%c0_11, %c0_12] : memref<1x256xf32, #tpu.memory_space<vmem>>, vector<1x256xf32>
      %cst = arith.constant dense<0.000000e+00> : vector<8xf32>
      %20 = vector.multi_reduction <add>, %17, %cst [1] : vector<8x256xf32> to vector<8xf32>
      %21 = vector.shape_cast %20 : vector<8xf32> to vector<8x1xf32>
      %cst_13 = arith.constant 2.560000e+02 : f32
      %22 = vector.broadcast %cst_13 : f32 to vector<8x1xf32>
      %23 = arith.divf %21, %22 : vector<8x1xf32>
      %24 = vector.broadcast %23 : vector<8x1xf32> to vector<8x256xf32>
      %25 = arith.subf %17, %24 : vector<8x256xf32>
      %26 = arith.mulf %25, %25 : vector<8x256xf32>
      %cst_14 = arith.constant dense<0.000000e+00> : vector<8xf32>
      %27 = vector.multi_reduction <add>, %26, %cst_14 [1] : vector<8x256xf32> to vector<8xf32>
      %28 = vector.shape_cast %27 : vector<8xf32> to vector<8x1xf32>
      %cst_15 = arith.constant 2.560000e+02 : f32
      %29 = vector.broadcast %cst_15 : f32 to vector<8x1xf32>
      %30 = arith.divf %28, %29 : vector<8x1xf32>
      %31 = vector.broadcast %23 : vector<8x1xf32> to vector<8x256xf32>
      %32 = arith.subf %17, %31 : vector<8x256xf32>
      %cst_16 = arith.constant 9.99999974E-6 : f32
      %33 = vector.broadcast %cst_16 : f32 to vector<8x1xf32>
      %34 = arith.addf %30, %33 : vector<8x1xf32>
      %35 = math.rsqrt %34 : vector<8x1xf32>
      %36 = vector.broadcast %35 : vector<8x1xf32> to vector<8x256xf32>
      %37 = arith.mulf %32, %36 : vector<8x256xf32>
      %38 = vector.broadcast %18 : vector<1x256xf32> to vector<8x256xf32>
      %39 = arith.mulf %37, %38 : vector<8x256xf32>
      %40 = vector.broadcast %19 : vector<1x256xf32> to vector<8x256xf32>
      %41 = arith.addf %39, %40 : vector<8x256xf32>
      %c0_17 = arith.constant 0 : index
      %c0_18 = arith.constant 0 : index
      %c0_19 = arith.constant 0 : index
      %42 = vector.load %arg15[%c0_17, %c0_18, %c0_19] : memref<1x8x256xf32, #tpu.memory_space<vmem>>, vector<1x8x256xf32>
      %43 = vector.shape_cast %42 : vector<1x8x256xf32> to vector<8x256xf32>
      %44 = vector.shape_cast %41 : vector<8x256xf32> to vector<1x8x256xf32>
      tpu.vector_store %arg15[%c0_17, %c0_18, %c0_19], %44 {strides = array<i32>} : memref<1x8x256xf32, #tpu.memory_space<vmem>>, vector<1x8x256xf32>,
    } else {
    }
    return
  }
  func.func @transform_0(%arg0: i32, %arg1: i32) -> (i32, i32, i32) {
    %c0_i32 = arith.constant 0 : i32
    %c0_i32_0 = arith.constant 0 : i32
    %c0_i32_1 = arith.constant 0 : i32
    return %arg0, %c0_i32, %c0_i32_0 : i32, i32, i32
  }
  func.func @transform_1(%arg0: i32, %arg1: i32) -> (i32, i32) {
    %c2_i32 = arith.constant 2 : i32
    %0 = arith.minsi %arg1, %c2_i32 : i32
    %c0_i32 = arith.constant 0 : i32
    %c0_i32_0 = arith.constant 0 : i32
    return %c0_i32, %0 : i32, i32
  }
  func.func @transform_2(%arg0: i32, %arg1: i32) -> (i32, i32) {
    %c2_i32 = arith.constant 2 : i32
    %0 = arith.minsi %arg1, %c2_i32 : i32
    %c0_i32 = arith.constant 0 : i32
    %c0_i32_0 = arith.constant 0 : i32
    return %c0_i32, %0 : i32, i32
  }
  func.func @transform_3(%arg0: i32, %arg1: i32) -> (i32, i32) {
    %c0_i32 = arith.constant 0 : i32
    %c0_i32_0 = arith.constant 0 : i32
    %c0_i32_1 = arith.constant 0 : i32
    return %c0_i32, %c0_i32_0 : i32, i32
  }
  func.func @transform_4(%arg0: i32, %arg1: i32) -> (i32, i32) {
    %c0_i32 = arith.constant 0 : i32
    %c0_i32_0 = arith.constant 0 : i32
    %c0_i32_1 = arith.constant 0 : i32
    return %c0_i32, %c0_i32_0 : i32, i32
  }
  func.func @transform_5(%arg0: i32, %arg1: i32) -> (i32, i32) {
    %c3_i32 = arith.constant 3 : i32
    %0 = arith.subi %arg1, %c3_i32 : i32
    %c0_i32 = arith.constant 0 : i32
    %1 = arith.maxsi %0, %c0_i32 : i32
    %c0_i32_0 = arith.constant 0 : i32
    %c0_i32_1 = arith.constant 0 : i32
    return %c0_i32_0, %1 : i32, i32
  }
  func.func @transform_6(%arg0: i32, %arg1: i32) -> (i32, i32) {
    %c3_i32 = arith.constant 3 : i32
    %0 = arith.subi %arg1, %c3_i32 : i32
    %c0_i32 = arith.constant 0 : i32
    %1 = arith.maxsi %0, %c0_i32 : i32
    %c0_i32_0 = arith.constant 0 : i32
    %c0_i32_1 = arith.constant 0 : i32
    return %c0_i32_0, %1 : i32, i32
  }
  func.func @transform_7(%arg0: i32, %arg1: i32) -> (i32, i32) {
    %c3_i32 = arith.constant 3 : i32
    %0 = arith.subi %arg1, %c3_i32 : i32
    %c0_i32 = arith.constant 0 : i32
    %1 = arith.maxsi %0, %c0_i32 : i32
    %c0_i32_0 = arith.constant 0 : i32
    %c0_i32_1 = arith.constant 0 : i32
    return %1, %c0_i32_0 : i32, i32
  }
  func.func @transform_8(%arg0: i32, %arg1: i32) -> (i32, i32) {
    %c0_i32 = arith.constant 0 : i32
    %c0_i32_0 = arith.constant 0 : i32
    %c0_i32_1 = arith.constant 0 : i32
    return %c0_i32, %c0_i32_0 : i32, i32
  }
  func.func @transform_9(%arg0: i32, %arg1: i32) -> (i32, i32) {
    %c0_i32 = arith.constant 0 : i32
    %c0_i32_0 = arith.constant 0 : i32
    %c0_i32_1 = arith.constant 0 : i32
    return %c0_i32, %c0_i32_0 : i32, i32
  }
  func.func @transform_10(%arg0: i32, %arg1: i32) -> (i32, i32) {
    %c0_i32 = arith.constant 0 : i32
    %c0_i32_0 = arith.constant 0 : i32
    %c0_i32_1 = arith.constant 0 : i32
    return %c0_i32, %c0_i32_0 : i32, i32
  }
  func.func @transform_11(%arg0: i32, %arg1: i32) -> (i32, i32) {
    %c0_i32 = arith.constant 0 : i32
    %c0_i32_0 = arith.constant 0 : i32
    %c0_i32_1 = arith.constant 0 : i32
    return %c0_i32, %c0_i32_0 : i32, i32
  }
  func.func @transform_12(%arg0: i32, %arg1: i32) -> (i32, i32) {
    %c0_i32 = arith.constant 0 : i32
    %c0_i32_0 = arith.constant 0 : i32
    %c0_i32_1 = arith.constant 0 : i32
    return %c0_i32, %c0_i32_0 : i32, i32
  }
  func.func @transform_13(%arg0: i32, %arg1: i32) -> (i32, i32, i32) {
    %c0_i32 = arith.constant 0 : i32
    %c0_i32_0 = arith.constant 0 : i32
    %c0_i32_1 = arith.constant 0 : i32
    return %arg0, %c0_i32, %c0_i32_0 : i32, i32, i32
  }
}

</mosaic_0001>

<bundles_post_ra>
// kernel: tpu_custom_call.1
= control target key start
LH: loop header
LB: loop body
LE: loop exit
PB: predicated region body
PF: predicated region fallthrough
CT: control target
= control target key end

     0   :  { %s3815_s0 = inlined_call_operand.hbm [shape: f32[1,8,256], index: 0, kind: input, shape index: {}]   ;;  %s3816_s1 = inlined_call_operand.hbm [shape: bf16[256,768], index: 1, kind: input, shape index: {}]   ;;  %s3817_s2 = inlined_call_operand.hbm [shape: f32[1,768], index: 2, kind: input, shape index: {}]   ;;  %s3818_s3 = inlined_call_operand.hbm [shape: bf16[256,256], index: 3, kind: input, shape index: {}]   ;;  %s3819_s4 = inlined_call_operand.vmem [shape: f32[1,256], index: 4, kind: input, shape index: {}]   ;;  %s3820_s5 = inlined_call_operand.hbm [shape: bf16[256,256], index: 5, kind: input, shape index: {}]   ;;  %s3821_s6 = inlined_call_operand.vmem [shape: f32[1,256], index: 6, kind: input, shape index: {}]   ;;  %s3822_s7 = inlined_call_operand.hbm [shape: bf16[256,256], index: 7, kind: input, shape index: {}]   ;;  %s3823_s8 = inlined_call_operand.vmem [shape: f32[1,256], index: 8, kind: input, shape index: {}]   ;;  %s3824_s9 = inlined_call_operand.vmem [shape: f32[1,256], index: 9, kind: input, shape index: {}]   ;;  %s3825_s10 = inlined_call_operand.hbm [shape: f32[1,256], index: 10, kind: input, shape index: {}]   ;;  %s3826_s11 = inlined_call_operand.vmem [shape: f32[1,256], index: 11, kind: input, shape index: {}]   ;;  %s3827_s12 = inlined_call_operand.hbm [shape: f32[1,256], index: 12, kind: input, shape index: {}]   ;;  %s3828_s13 = inlined_call_operand.hbm [shape: f32[1,8,256], index: 13, kind: output, shape index: {}]  }
   0x1   :  { %3842 = sst [smem:[#allocation33_spill]] %s3815_s0 }
   0x2   :  { %3843 = sst [smem:[#allocation34_spill]] %s3816_s1 }
   0x3   :  { %3844 = sst [smem:[#allocation35_spill]] %s3817_s2 }
   0x4   :  { %3845 = sst [smem:[#allocation36_spill]] %s3818_s3 }
   0x5   :  { %3846 = sst [smem:[#allocation37_spill]] %s3819_s4 }
   0x6   :  { %3847 = sst [smem:[#allocation38_spill]] %s3821_s6 }
   0x7   :  { %3848 = sst [smem:[#allocation39_spill]] %s3823_s8 }
   0x8   :  { %3849 = sst [smem:[#allocation40_spill]] %s3824_s9 }
   0x9   :  { %3850 = sst [smem:[#allocation41_spill]] %s3825_s10 }
   0xa   :  { %3851 = sst [smem:[#allocation42_spill]] %s3826_s11 }
   0xb   :  { %3852 = sst [smem:[#allocation43_spill]] %s3828_s13 }
   0xc   :  { %18 = vsyncpa [#allocation6], 0 }
   0xd   :  { %19 = vsyncpa [#allocation9], 0 }
   0xe   :  { %21 = vsyncpa [#allocation9 + $0x1], 0 }
   0xf   :  { %22 = vsyncpa [#allocation12], 0 }
  0x10   :  { %23 = vsyncpa [#allocation17], 0 }
  0x11   :  { %24 = vsyncpa [#allocation7], 0  ;;  %s3355_s25 = smov 0   ;;  %s3357_s26 = smov 0  }
  0x12   :  { %s3359_s27 = smov 0   ;;  %s3361_s28 = smov 0  }
  0x13   :  { %s3363_s29 = smov 0   ;;  %s3365_s30 = smov 0  }
  0x14   :  { %s3367_s14 = smov 0   ;;  %s3369_s15 = smov 0  }
  0x15   :  { %s3371_s16 = smov 0  }
  0x16 LB: > { %3853 = sst [smem:[#allocation27_spill]] %s3253_s29  ;;  %s39_s17 = sadd.s32 1, %s3265_s15  ;;  %s3269_s16 = sphi %s3371_s16, %s30_s16   ;;  %s3265_s15 = sphi %s3369_s15, %s3896_s15   ;;  %s3261_s14 = sphi %s3367_s14, %s3895_s14   ;;  %s3257_s30 = sphi %s3365_s30, %s3891_s30   ;;  %s3253_s29 = sphi %s3363_s29, %s3890_s29   ;;  %s3249_s28 = sphi %s3361_s28, %s3889_s28   ;;  %s3245_s27 = sphi %s3359_s27, %s3894_s27   ;;  %s3241_s26 = sphi %s3357_s26, %s3893_s26   ;;  %s3237_s25 = sphi %s3355_s25, %s3892_s25  }
  0x17   : > { %3854 = sst [smem:[#allocation28_spill]] %s3257_s30  ;;  %p72_p0 = scmp.lt.s32.totalorder %s3265_s15, 2 }
  0x18   : > { %3855 = sst [smem:[#allocation29_spill]] %s3261_s14  ;;  %p40_p1 = scmp.ge.s32.totalorder %s39_s17, 5 }
  0x19   : > { %s79_s18 = sadd.s32 1, %s3257_s30  ;;  %p86_p2 = scmp.ne.s32.totalorder %s3257_s30, %s3253_s29 }
  0x1a   : > { %s3404_s19 = scalar_select %p72_p0, %s3265_s15, 2 }
  0x1b   : > { %s3898_s17 = smov (%p40_p1, %s39_s17), 0  ;;  %p87_p3 = scmp.eq.s32.totalorder %s3269_s16, 0 }
  0x1c   : > { %p74_p4 = scmp.lt.s32.totalorder %s3898_s17, 2  ;;  %p2781_p6 = scmp.lt.s32.totalorder %s3269_s16, 5 }
  0x1d   : > { %p3414_p5 = por %p87_p3, %p86_p2  ;;  %s3831_s23 = sand.u32 1, %s3269_s16  }
  0x1e   : > { %s75_s21 = scalar_select %p74_p4, %s3898_s17, 2 }
  0x1f   : > { %s3830_s24 = sand.u32 1, %s3257_s30   ;;  %s2622_s13 = sshll.u32 %s3404_s19, 3 }
  0x20   : > { %s76_s22 = ssub.s32 %s3404_s19, %s75_s21  ;;  %s2184_s8 = sshll.u32 %s3830_s24, 8 }
  0x21   : > { %p77_p7 = scmp.eq.s32.totalorder %s76_s22, 0  ;;  %s3858_s1 = sld [smem:[#allocation34_spill]] }
  0x22   : > { %s484_s21 = scalar_lea.vmem [#allocation8], %s2184_s8  ;;  %p3436_p8 = pnand %p2781_p6, %p3414_p5 }
  0x23   : > { %s3425_s11 = scalar_select %p77_p7, %s3257_s30, %s79_s18  }
  0x24   : > { %s494_s22 = sshll.u32 %s484_s21, 4  ;;  %s3442_s24 = scalar_lea.sflag [#allocation9], %s3831_s23  ;;  %s495_s22 = int_to_ptr.vmem [resolvable:$true] %s494_s22 }
  0x25   : > { %3857 = sst [smem:[#allocation30_spill]] %s3425_s11  ;;  %s3271_s4 = smov 384  }
  0x26   : > { %s3832_s9 = smov 128   ;;  %p92_p9 = scmp.ne.s32.totalorder %s3253_s29, %s3249_s28 }
  0x27   : > { %s491_s6 = scalar_lea.hbm %s3858_s1, %s2622_s13  ;;  %s3834_s13 = smov 8  }
  0x28   : > { %s492_s14 = sshll.u32 %s491_s6, 4  ;;  %s3450_s6 = sadd.s32 4294967295, %s3269_s16   ;;  %s493_s14 = int_to_ptr.hbm [resolvable:$true] %s492_s14 }
  0x29   : > { %2767 = dma.hbm_to_vmem [thread:$0]  (!%p3436_p8), %s493_s14, 4096, %s495_s22, %s3442_s24, %s3271_s4, %s3832_s9, %s3834_s13  }
  0x2a   : > { %p93_p10 = scmp.eq.s32.totalorder %s3450_s6, 0  ;;  %p196_p11 = scmp.ne.s32.totalorder %s3241_s26, %s3237_s25 }
  0x2b   : > { %p2178_p12 = scmp.ge.s32.totalorder %s3269_s16, 1  ;;  %p402_p0 = scmp.lt.s32.totalorder %s3269_s16, 6 }
  0x2c   : > { %p3460_p13 = por %p93_p10, %p92_p9  ;;  %p3467_p1 = por %p196_p11, %p93_p10 }
  0x2d   : > { %p3471_p2 = pnand %p2178_p12, %p402_p0  ;;  %s3865_s0 = sld [smem:[#allocation33_spill]] }
  0x2e   : > { %s3860_s8 = scalar_select %p3460_p13, 1, 0 }
  0x2f   : > { %s3862_s14 = scalar_select %p3467_p1, 1, 0 }
  0x30   : > { %3861 = sst [smem:[#allocation31_spill]] %s3860_s8  ;;  %p2751_p4 = pneg %p3471_p2 }
  0x31   : > { %3863 = sst [smem:[#allocation32_spill]] %s3862_s14  ;;  %s3274_s22 = smov [#allocation5]  }
  0x32   : > { %s419_s4 = sshll.u32 %s3274_s22, 4  ;;  %s3866_s3 = sld [smem:[#allocation36_spill]]  ;;  %s420_s4 = int_to_ptr.vmem [resolvable:$true] %s419_s4 }
  0x33   : > { %s417_s25 = sshll.u32 %s3865_s0, 4  ;;  %p3485_p5 = pnand %p2751_p4, %p93_p10  ;;  %s418_s25 = int_to_ptr.hbm [resolvable:$true] %s417_s25 }
  0x34   : > { %s3868_s28 = sand.u32 1, %s3257_s30   ;;  %s3275_s0 = smov [#allocation11]  }
  0x35   : > { %s2187_s21 = sshll.u32 %s3868_s28, 1  ;;  %s430_s11 = sshll.u32 %s3275_s0, 4  ;;  %s431_s11 = int_to_ptr.vmem [resolvable:$true] %s430_s11 }
  0x36   : > { %2754 = dma.hbm_to_vmem [thread:$0]  (!%p3485_p5), %s418_s25, 256, %s420_s4, [#allocation6]  }
  0x37   : > { %s3869_s23 = smov 8   ;;  %s3870_s9 = smov 128  }
  0x38   : > { %s428_s13 = sshll.u32 %s3866_s3, 4  ;;  %s2188_s22 = sshll.u32 %s3404_s19, 1  ;;  %s429_s13 = int_to_ptr.hbm [resolvable:$true] %s428_s13 }
  0x39   : > { %2757 = dma.hbm_to_vmem [thread:$0]  (!%p3485_p5), %s429_s13, 4096, %s431_s11, [#allocation12], %s3870_s9, %s3870_s9, %s3869_s23  }
  0x3a   : > { %s508_s3 = scalar_lea.vmem [#allocation10], %s2187_s21  ;;  %s3871_s2 = sld [smem:[#allocation35_spill]] }
  0x3b   : > { %s518_s14 = sshll.u32 %s508_s3, 4  ;;  %s3872_s10 = sld [smem:[#allocation41_spill]]  ;;  %s519_s14 = int_to_ptr.vmem [resolvable:$true] %s518_s14 }
  0x3c   : > { %s467_s29 = sshll.u32 %s3827_s12, 4  ;;  %s3276_s19 = smov [#allocation15]   ;;  %s468_s29 = int_to_ptr.hbm [resolvable:$true] %s467_s29 }
  0x3d   : > { %s454_s13 = sshll.u32 %s3276_s19, 4  ;;  %s2172_s18 = sadd.s32 4294967293, %s3265_s15  ;;  %s455_s13 = int_to_ptr.vmem [resolvable:$true] %s454_s13 }
  0x3e   : > { %p175_p7 = scmp.gt.s32.totalorder %s2172_s18, 0  ;;  %s183_s21 = sadd.s32 1, %s3245_s27 }
  0x3f   : > { %p190_p9 = scmp.ne.s32.totalorder %s3245_s27, %s3241_s26 }
  0x40   : > { %s514_s30 = scalar_lea.hbm %s3871_s2, %s2188_s22  ;;  %s3900_s18 = smov (!%p175_p7, %s2172_s18), 0 }
  0x41   : > { %s516_s0 = sshll.u32 %s514_s30, 4  ;;  %s452_s4 = sshll.u32 %s3872_s10, 4  ;;  %s517_s0 = int_to_ptr.hbm [resolvable:$true] %s516_s0  ;;  %s453_s4 = int_to_ptr.hbm [resolvable:$true] %s452_s4 }
  0x42   : > { %2770 = dma.hbm_to_vmem [thread:$0]  (!%p3436_p8), %s517_s0, 32, %s519_s14, %s3442_s24  }
  0x43   : > { %2760 = dma.hbm_to_vmem [thread:$0]  (!%p3485_p5), %s453_s4, 32, %s455_s13, [#allocation12]  }
  0x44   : > { %s3277_s30 = smov [#allocation16]   ;;  %s2173_s14 = sadd.s32 4294967293, %s3898_s17 }
  0x45   : > { %s469_s8 = sshll.u32 %s3277_s30, 4  ;;  %p178_p8 = scmp.gt.s32.totalorder %s2173_s14, 0  ;;  %s470_s8 = int_to_ptr.vmem [resolvable:$true] %s469_s8 }
  0x46   : > { %2763 = dma.hbm_to_vmem [thread:$0]  (!%p3485_p5), %s468_s29, 32, %s470_s8, [#allocation17]  }
  0x47   : > { %s3902_s14 = smov (!%p178_p8, %s2173_s14), 0  ;;  %p192_p11 = por %p190_p9, %p87_p3 }
  0x48   : > { %s527_s22 = sand.u32 1, %s3245_s27   ;;  %s180_s0 = ssub.s32 %s3900_s18, %s3902_s14 }
  0x49   : > { %s2189_s28 = sshll.u32 %s527_s22, 7  ;;  %p181_p12 = scmp.eq.s32.totalorder %s180_s0, 0 }
  0x4a   : > { %s2191_s25 = sshll.u32 %s3900_s18, 2  ;;  %s529_s1 = scalar_lea.vmem [#allocation13], %s2189_s28 }
  0x4b   : > { %s539_s4 = sshll.u32 %s529_s1, 4  ;;  %s536_s19 = scalar_lea.hbm %s3820_s5, %s2191_s25  ;;  %s540_s4 = int_to_ptr.vmem [resolvable:$true] %s539_s4 }
  0x4c   : > { %s3524_s11 = scalar_select %p181_p12, %s3245_s27, %s183_s21  }
  0x4d   : > { %s537_s13 = sshll.u32 %s536_s19, 4  ;;  %p2771_p0 = pnand %p2781_p6, %p192_p11  ;;  %s538_s13 = int_to_ptr.hbm [resolvable:$true] %s537_s13 }
  0x4e   : > { %s3873_s30 = sand.u32 1, %s3269_s16   ;;  %s3278_s14 = smov 64  }
  0x4f   : > { %s526_s8 = scalar_lea.sflag [#allocation6], %s3873_s30  ;;  %s3279_s22 = smov 4  }
  0x50   : > { %2773 = dma.hbm_to_vmem [thread:$0]  (!%p2771_p0), %s538_s13, 2048, %s540_s4, %s526_s8, %s3870_s9, %s3278_s14, %s3279_s22  }
  0x51   : > { %s2624_s0 = sshll.u32 %s3900_s18, 7  ;;  %s565_s10 = scalar_lea.vmem [#allocation14], %s2189_s28 }
  0x52   : > { %s574_s2 = scalar_lea.hbm %s3822_s7, %s2624_s0  ;;  %s577_s3 = sshll.u32 %s565_s10, 4  ;;  %s578_s3 = int_to_ptr.vmem [resolvable:$true] %s577_s3 }
  0x53   : > { %s575_s25 = sshll.u32 %s574_s2, 4  ;;  %589 = sbr.rel (%p3471_p2) target bundleno = 2547 (0x9f3), region = 72  ;;  %s576_s25 = int_to_ptr.hbm [resolvable:$true] %s575_s25 }
  0x54   : > { %2776 = dma.hbm_to_vmem [thread:$0]  (!%p2771_p0), %s576_s25, 2048, %s578_s3, %s3442_s24, %s3870_s9, %s3870_s9, %s3869_s23  }
  0x58   : > { %3204 = dma.done.wait (%p93_p10), [#allocation6], 256  }
  0x59   : > { %3206 = vsyncadd (%p93_p10), [#allocation6], 4294967040  ;;  %s3874_s18 = sld [smem:[#allocation27_spill]]  ;;  %s596_s10 = sand.u32 1, %s3450_s6  }
  0x5a   : > { %s597_s29 = scalar_lea.sflag [#allocation9], %s596_s10 }
  0x5f   : > { %s598_s2 = sand.u32 1, %s3874_s18  }
  0x60   : > { %s2199_s4 = sshll.u32 %s598_s2, 8 }
  0x61   : > { %s3549_s19 = scalar_lea.vmem [#allocation8], %s2199_s4 }
  0x62   : > { %3208 = dma.done.wait (%p3460_p13), %s597_s29, 4128  }
  0x63   : > { %3210 = vsyncadd (%p3460_p13), %s597_s29, 4294963168  ;;  %s3555_s24 = sshll.u32 %s598_s2, 1 }
  0x64   : > { %s610_s20 = scalar_lea.vmem [#allocation10], %s3555_s24 }
  0x65   : > { %3212 = dma.done.wait (%p93_p10), [#allocation12], 4096  }
  0x66   : > { %3214 = vsyncadd (%p93_p10), [#allocation12], 4294963200  ;;  %s623_s9 = sand.u32 1, %s3241_s26   ;;  %s622_s30 = scalar_lea.sflag [#allocation6], %s596_s10 }
  0x67   : > { %s2202_s13 = sshll.u32 %s623_s9, 7 }
  0x68   : > { %s3563_s8 = scalar_lea.vmem [#allocation13], %s2202_s13 }
  0x69   : > { %3216 = dma.done.wait (%p3467_p1), %s622_s30, 2048  }
  0x6a   : > { %3218 = vsyncadd (%p3467_p1), %s622_s30, 4294965248  ;;  %s3569_s14 = scalar_lea.vmem [#allocation14], %s2202_s13 }
  0x6b   : > { %3220 = dma.done.wait (%p3467_p1), %s597_s29, 2048  }
  0x6c   : > { %3222 = vsyncadd (%p3467_p1), %s597_s29, 4294965248 }
  0x6d   : > { %3224 = dma.done.wait (%p93_p10), [#allocation12], 32  }
  0x6e   : > { %3226 = vsyncadd (%p93_p10), [#allocation12], 4294967264 }
  0x6f   : > { %3228 = dma.done.wait (%p93_p10), [#allocation17], 32  }
  0x70   : > { %3230 = vsyncadd (%p93_p10), [#allocation17], 4294967264  ;;  %s3877_s22 = sld [smem:[#allocation29_spill]] }
  0x71   : > { %s3878_s3 = sld [smem:[#allocation38_spill]] }
  0x76   : > { %s2206_s0 = sadd.s32 4294967293, %s3877_s22  ;;  %p2212_p13 = scmp.ge.s32.totalorder %s3877_s22, 3 }
  0x77   : > { %p715_p3 = scmp.gt.s32.totalorder %s2206_s0, 0  ;;  %p2207_p6 = scmp.lt.s32.totalorder %s2206_s0, 1 }
  0x78   : > { %731 = sbr.rel (%p2212_p13) target bundleno = 301 (0x12d), region = 108  ;;  %s3879_s18 = sld [smem:[#allocation29_spill]] (!%p2212_p13) }
  0x79   : > { %s3904_s0 = smov (!%p715_p3, %s2206_s0), 0 }
  0x7a   : > { %s3906_s0 = smov (!%p2207_p6, %s3904_s0), 1 }
  0x7b   : > { %s719_s25 = scalar_lea.vmem %s3878_s3, %s3906_s0 }
  0x7d   : > { %v2271_v0 = vld [vmem:[%s3549_s19 + $0x70] sm:$0xf]  ;;  %v2642_v1 = vld [vmem:[%s3549_s19 + $0x74] sm:$0xf0]  ;;  %v2641_v5 = vld [vmem:[%s3549_s19 + $0x74] sm:$0xf] }
  0x7e   : > { %v2335_v2 = vld [vmem:[%s3549_s19 + $0xf0] sm:$0xf]  ;;  %v2272_v3 = vor.u32 %v2642_v1, %v2271_v0  ;;  %v2658_v4 = vld [vmem:[%s3549_s19 + $0xf4] sm:$0xf0]  ;;  %v2273_v6 = vld [vmem:[%s3549_s19 + $0x78] sm:$0xf0] }
  0x7f   : > { %v2336_v7 = vor.u32 %v2658_v4, %v2335_v2  ;;  %v2276_v8 = vor.u32 %v2641_v5, %v2273_v6  ;;  %v2657_v9 = vld [vmem:[%s3549_s19 + $0xf4] sm:$0xf]  ;;  %v2337_v10 = vld [vmem:[%s3549_s19 + $0xf8] sm:$0xf0]  ;;  %v2263_v11 = vld [vmem:[%s3549_s19 + $0x60] sm:$0xf] }
  0x80   : > { %934 = vmatpush.bf16.msra.mxu0 %v2272_v3  ;;  %v2340_v12 = vor.u32 %v2657_v9, %v2337_v10  ;;  %v2640_v13 = vld [vmem:[%s3549_s19 + $0x64] sm:$0xf0]  ;;  %v2327_v14 = vld [vmem:[%s3549_s19 + $0xe0] sm:$0xf]  ;;  %v2639_v18 = vld [vmem:[%s3549_s19 + $0x64] sm:$0xf] }
  0x81   : > { %v2656_v15 = vld [vmem:[%s3549_s19 + $0xe4] sm:$0xf0]  ;;  %947 = vmatpush.bf16.msra.mxu1 %v2336_v7  ;;  %960 = vmatpush.bf16.msra.mxu2 %v2276_v8  ;;  %v2264_v16 = vor.u32 %v2640_v13, %v2263_v11  ;;  %v2265_v19 = vld [vmem:[%s3549_s19 + $0x68] sm:$0xf0]  ;;  %v2655_v20 = vld [vmem:[%s3549_s19 + $0xe4] sm:$0xf] }
  0x82   : > { %v2328_v17 = vor.u32 %v2656_v15, %v2327_v14  ;;  %973 = vmatpush.bf16.msra.mxu3 %v2340_v12  ;;  %v2268_v21 = vor.u32 %v2639_v18, %v2265_v19  ;;  %v2329_v22 = vld [vmem:[%s3549_s19 + $0xe8] sm:$0xf0]  ;;  %v2255_v23 = vld [vmem:[%s3549_s19 + $0x50] sm:$0xf]  ;;  %v2638_v24 = vld [vmem:[%s3549_s19 + $0x54] sm:$0xf0] }
  0x83   : > { %v2332_v25 = vor.u32 %v2655_v20, %v2329_v22  ;;  %v2319_v26 = vld [vmem:[%s3549_s19 + $0xd0] sm:$0xf]  ;;  %v2654_v27 = vld [vmem:[%s3549_s19 + $0xd4] sm:$0xf0]  ;;  %v2637_v28 = vld [vmem:[%s3549_s19 + $0x54] sm:$0xf]  ;;  %v2256_v29 = vor.u32 %v2638_v24, %v2255_v23 }
  0x84   : > { %935 = vmatpush.bf16.msra.mxu0 %v2264_v16  ;;  %v2257_v30 = vld [vmem:[%s3549_s19 + $0x58] sm:$0xf0]  ;;  %v2653_v31 = vld [vmem:[%s3549_s19 + $0xd4] sm:$0xf]  ;;  %v2320_v33 = vor.u32 %v2654_v27, %v2319_v26  ;;  %v2247_v35 = vld [vmem:[%s3549_s19 + $0x40] sm:$0xf] }
  0x85   : > { %v2321_v32 = vld [vmem:[%s3549_s19 + $0xd8] sm:$0xf0]  ;;  %948 = vmatpush.bf16.msra.mxu1 %v2328_v17  ;;  %961 = vmatpush.bf16.msra.mxu2 %v2268_v21  ;;  %v2260_v34 = vor.u32 %v2637_v28, %v2257_v30  ;;  %v2636_v36 = vld [vmem:[%s3549_s19 + $0x44] sm:$0xf0]  ;;  %v2311_v37 = vld [vmem:[%s3549_s19 + $0xc0] sm:$0xf] }
  0x86   : > { %974 = vmatpush.bf16.msra.mxu3 %v2332_v25  ;;  %v2324_v38 = vor.u32 %v2653_v31, %v2321_v32  ;;  %v2652_v39 = vld [vmem:[%s3549_s19 + $0xc4] sm:$0xf0]  ;;  %v2635_v40 = vld [vmem:[%s3549_s19 + $0x44] sm:$0xf]  ;;  %v2249_v41 = vld [vmem:[%s3549_s19 + $0x48] sm:$0xf0]  ;;  %v2248_v44 = vor.u32 %v2636_v36, %v2247_v35 }
  0x87   : > { %v2651_v42 = vld [vmem:[%s3549_s19 + $0xc4] sm:$0xf]  ;;  %v2313_v43 = vld [vmem:[%s3549_s19 + $0xc8] sm:$0xf0]  ;;  %v2312_v45 = vor.u32 %v2652_v39, %v2311_v37  ;;  %v2252_v46 = vor.u32 %v2635_v40, %v2249_v41  ;;  %v2239_v47 = vld [vmem:[%s3549_s19 + $0x30] sm:$0xf] }
  0x88   : > { %936 = vmatpush.bf16.msra.mxu0 %v2256_v29  ;;  %v2634_v48 = vld [vmem:[%s3549_s19 + $0x34] sm:$0xf0]  ;;  %v2303_v49 = vld [vmem:[%s3549_s19 + $0xb0] sm:$0xf]  ;;  %v2316_v50 = vor.u32 %v2651_v42, %v2313_v43  ;;  %v2633_v52 = vld [vmem:[%s3549_s19 + $0x34] sm:$0xf] }
  0x89   : > { %949 = vmatpush.bf16.msra.mxu1 %v2320_v33  ;;  %962 = vmatpush.bf16.msra.mxu2 %v2260_v34  ;;  %v2650_v51 = vld [vmem:[%s3549_s19 + $0xb4] sm:$0xf0]  ;;  %v2241_v53 = vld [vmem:[%s3549_s19 + $0x38] sm:$0xf0]  ;;  %v2649_v54 = vld [vmem:[%s3549_s19 + $0xb4] sm:$0xf]  ;;  %v2240_v56 = vor.u32 %v2634_v48, %v2239_v47 }
  0x8a   : > { %975 = vmatpush.bf16.msra.mxu3 %v2324_v38  ;;  %v2305_v55 = vld [vmem:[%s3549_s19 + $0xb8] sm:$0xf0]  ;;  %v2304_v57 = vor.u32 %v2650_v51, %v2303_v49  ;;  %v2244_v58 = vor.u32 %v2633_v52, %v2241_v53  ;;  %v2231_v59 = vld [vmem:[%s3549_s19 + $0x20] sm:$0xf]  ;;  %v2632_v60 = vld [vmem:[%s3549_s19 + $0x24] sm:$0xf0] }
  0x8b   : > { %v2295_v61 = vld [vmem:[%s3549_s19 + $0xa0] sm:$0xf]  ;;  %v2308_v62 = vor.u32 %v2649_v54, %v2305_v55  ;;  %v2648_v63 = vld [vmem:[%s3549_s19 + $0xa4] sm:$0xf0]  ;;  %v2631_v0 = vld [vmem:[%s3549_s19 + $0x24] sm:$0xf]  ;;  %v2232_v4 = vor.u32 %v2632_v60, %v2231_v59 }
  0x8c   : > { %937 = vmatpush.bf16.msra.mxu0 %v2248_v44  ;;  %v2233_v1 = vld [vmem:[%s3549_s19 + $0x28] sm:$0xf0]  ;;  %v2647_v2 = vld [vmem:[%s3549_s19 + $0xa4] sm:$0xf]  ;;  %v2296_v5 = vor.u32 %v2648_v63, %v2295_v61  ;;  %v2223_v7 = vld [vmem:[%s3549_s19 + $0x10] sm:$0xf] }
  0x8d   : > { %950 = vmatpush.bf16.msra.mxu1 %v2312_v45  ;;  %963 = vmatpush.bf16.msra.mxu2 %v2252_v46  ;;  %v2297_v3 = vld [vmem:[%s3549_s19 + $0xa8] sm:$0xf0]  ;;  %v2236_v6 = vor.u32 %v2631_v0, %v2233_v1  ;;  %v2630_v8 = vld [vmem:[%s3549_s19 + $0x14] sm:$0xf0]  ;;  %v2287_v9 = vld [vmem:[%s3549_s19 + $0x90] sm:$0xf] }
  0x8e   : > { %976 = vmatpush.bf16.msra.mxu3 %v2316_v50  ;;  %v2300_v10 = vor.u32 %v2647_v2, %v2297_v3  ;;  %v2646_v11 = vld [vmem:[%s3549_s19 + $0x94] sm:$0xf0]  ;;  %v2629_v12 = vld [vmem:[%s3549_s19 + $0x14] sm:$0xf]  ;;  %v2225_v13 = vld [vmem:[%s3549_s19 + $0x18] sm:$0xf0]  ;;  %v2224_v16 = vor.u32 %v2630_v8, %v2223_v7 }
  0x8f   : > { %v2645_v14 = vld [vmem:[%s3549_s19 + $0x94] sm:$0xf]  ;;  %v2289_v15 = vld [vmem:[%s3549_s19 + $0x98] sm:$0xf0]  ;;  %v2288_v17 = vor.u32 %v2646_v11, %v2287_v9  ;;  %v2228_v18 = vor.u32 %v2629_v12, %v2225_v13  ;;  %v2215_v19 = vld [vmem:[%s3549_s19] sm:$0xf] }
  0x90   : > { %938 = vmatpush.bf16.msra.mxu0 %v2240_v56  ;;  %v2628_v20 = vld [vmem:[%s3549_s19 + $0x4] sm:$0xf0]  ;;  %v2279_v21 = vld [vmem:[%s3549_s19 + $0x80] sm:$0xf]  ;;  %v2292_v22 = vor.u32 %v2645_v14, %v2289_v15  ;;  %v2627_v24 = vld [vmem:[%s3549_s19 + $0x4] sm:$0xf] }
  0x91   : > { %951 = vmatpush.bf16.msra.mxu1 %v2304_v57  ;;  %964 = vmatpush.bf16.msra.mxu2 %v2244_v58  ;;  %v2644_v23 = vld [vmem:[%s3549_s19 + $0x84] sm:$0xf0]  ;;  %v2217_v25 = vld [vmem:[%s3549_s19 + $0x8] sm:$0xf0]  ;;  %v2643_v26 = vld [vmem:[%s3549_s19 + $0x84] sm:$0xf]  ;;  %v2216_v28 = vor.u32 %v2628_v20, %v2215_v19 }
  0x92   : > { %977 = vmatpush.bf16.msra.mxu3 %v2308_v62  ;;  %v2281_v27 = vld [vmem:[%s3549_s19 + $0x88] sm:$0xf0]  ;;  %v732_v29 = vld [vmem:[#allocation5] sm:$0xff]  ;;  %v2280_v30 = vor.u32 %v2644_v23, %v2279_v21  ;;  %v2220_v31 = vor.u32 %v2627_v24, %v2217_v25  ;;  %v733_v32 = vld [vmem:[#allocation5 + $0x8] sm:$0xff]  ;;  %s2341_s28 = sshll.u32 %s3879_s18, 8 }
  0x93   : > { %v2284_v33 = vor.u32 %v2643_v26, %v2281_v27  ;;  %v734_v34 = vpack.c.bf16 %v732_v29, %v732_v29  ;;  %v735_v35 = vpack.c.bf16 %v733_v32, %v733_v32  ;;  %v768_v36 = vld [vmem:[%s610_s20] sm:$0x3]  ;;  %s988_s10 = sshra.s32 %s2341_s28, 7 }
  0x94   : > { %939 = vmatpush.bf16.msra.mxu0 %v2232_v4  ;;  %v770_v39 = vperm.slane %v768_v36, 0  ;;  %v771_v40 = vperm.slane %v768_v36, 1  ;;  %s2342_s2 = sshll.u32 %s988_s10, 2 }
  0x95   : > { %952 = vmatpush.bf16.msra.mxu1 %v2296_v5  ;;  %965 = vmatpush.bf16.msra.mxu2 %v2236_v6  ;;  %s991_s4 = scalar_lea.vmem [#allocation2], %s2342_s2 }
  0x96   : > { %978 = vmatpush.bf16.msra.mxu3 %v2300_v10 }
  0x98   : > { %940 = vmatpush.bf16.msra.mxu0 %v2224_v16 }
  0x99   : > { %953 = vmatpush.bf16.msra.mxu1 %v2288_v17  ;;  %966 = vmatpush.bf16.msra.mxu2 %v2228_v18 }
  0x9a   : > { %979 = vmatpush.bf16.msra.mxu3 %v2292_v22 }
  0x9c   : > { %941 = vmatpush.bf16.msra.mxu0 %v2216_v28 }
  0x9d   : > { %954 = vmatpush.bf16.msra.mxu1 %v2280_v30  ;;  %967 = vmatpush.bf16.msra.mxu2 %v2220_v31 }
  0x9e   : > { %980 = vmatpush.bf16.msra.mxu3 %v2284_v33 }
  0x9f   : > { %942 = vmatmul.bf16.vlgmr.msra.gmra.mxu0 %v734_v34 }
  0xa0   : > { %955 = vmatmul.bf16.vlgmr.msra.gmra.mxu1 %v735_v35  ;;  %968 = vmatmul.bf16.vlgmr.msra.gmra.mxu2 %v734_v34 }
  0xa1   : > { %981 = vmatmul.bf16.vlgmr.msra.gmra.mxu3 %v735_v35 }
 0x11c   : > { %v943_v37 = vpop.f32.mrf.mxu0 }
 0x11d   : > { %v956_v38 = vpop.f32.mrf.mxu1  ;;  %v944_v41 = vadd.f32 %v943_v37, %v770_v39 }
 0x11f   : > { %v957_v47 = vadd.f32 %v956_v38, %v944_v41 }
 0x123   : > { %v969_v42 = vpop.f32.mrf.mxu2 }
 0x124   : > { %v970_v43 = vadd.f32 %v969_v42, %v771_v40  ;;  %v982_v44 = vpop.f32.mrf.mxu3  ;;  %v945_v45 = vpop.f32.mrf.mxu0 }
 0x125   : > { %v958_v46 = vpop.f32.mrf.mxu1 }
 0x126   : > { %v983_v48 = vadd.f32 %v982_v44, %v970_v43 }
 0x128   : > { %v987_v49 = vpack.c.bf16 %v983_v48, %v957_v47 }
 0x12a   : > { %992 = vst [vmem:[%s991_s4] sm:$0xff] %v987_v49 }
 0x12b   : > { %v971_v50 = vpop.f32.mrf.mxu2 }
 0x12c   : > { %v984_v51 = vpop.f32.mrf.mxu3 }
 0x12d PF: > { %s3880_s29 = sld [smem:[#allocation29_spill]] }
 0x133   : > { %p2343_p10 = scmp.ne.s32.totalorder %s3880_s29, 2 }
 0x134   : > { %s3280_s19 = smov (!%p2343_p10), 64   ;;  %s3881_s23 = sld [smem:[#allocation37_spill]] (!%p2343_p10) }
 0x135   : > { %996 = sbr.rel (%p2343_p10) target bundleno = 1926 (0x786), region = 112  ;;  %s3882_s30 = sld [smem:[#allocation40_spill]] (!%p2343_p10) }
 0x13a   : > { %v1000_v52 = vld [vmem:[#allocation2 + $0x8] sm:$0xf]  ;;  %vm1002_vm0 = vcmask 523264   ;;  %v1001_v55 = vld [vmem:[#allocation2 + $0x10] sm:$0xf]  ;;  %vm1023_vm1 = vcmask 64512  }
 0x13b   : > { %v1007_v53 = vsel %vm1002_vm0, %v1000_v52, 0  ;;  %v1071_v54 = vunpack.c.l.b16 %v1000_v52  ;;  %v999_v56 = vld [vmem:[#allocation2] sm:$0xf]  ;;  %v1108_v57 = vunpack.c.l.b16 %v1001_v55  ;;  %vm1039_vm2 = vcmask 1043456   ;;  %v2408_v17 = vld [vmem:[#allocation11 + $0x30] sm:$0xf] }
 0x13c   : > { %1016 = vmatpush.bf16.xpose.msra.mxu0 %v1007_v53  ;;  %v1066_v60 = vunpack.c.l.b16 %v999_v56  ;;  %v1041_v15 = vsel %vm1039_vm2, %v1001_v55, 0  ;;  %v2666_v18 = vld [vmem:[#allocation11 + $0x34] sm:$0xf0]  ;;  %v2665_v20 = vld [vmem:[#allocation11 + $0x34] sm:$0xf] }
 0x13d   : > { %v1072_v58 = vpack.c.b16 %v1071_v54, %v1071_v54  ;;  %v1109_v59 = vpack.c.b16 %v1108_v57, %v1108_v57  ;;  %1050 = vmatpush.bf16.msra.mxu1 %v1041_v15  ;;  %v2409_v19 = vor.u32 %v2666_v18, %v2408_v17  ;;  %v2410_v21 = vld [vmem:[#allocation11 + $0x38] sm:$0xf0]  ;;  %v2400_v32 = vld [vmem:[#allocation11 + $0x20] sm:$0xf]  ;;  %v2664_v33 = vld [vmem:[#allocation11 + $0x24] sm:$0xf0] }
 0x13e   : > { %v1067_v61 = vpack.c.b16 %v1066_v60, %v1066_v60  ;;  %v2413_v22 = vor.u32 %v2665_v20, %v2410_v21  ;;  %v2663_v34 = vld [vmem:[#allocation11 + $0x24] sm:$0xf]  ;;  %v2401_v35 = vor.u32 %v2664_v33, %v2400_v32  ;;  %v2402_v36 = vld [vmem:[#allocation11 + $0x28] sm:$0xf0]  ;;  %v2392_v37 = vld [vmem:[#allocation11 + $0x10] sm:$0xf] }
 0x13f   : > { %1073 = vrot.lane.b32.xlu0 %v1072_v58, %s3280_s19  ;;  %1110 = vrot.lane.b32.xlu2 %v1109_v59, %s3280_s19  ;;  %v2662_v38 = vld [vmem:[#allocation11 + $0x14] sm:$0xf0]  ;;  %v2405_v39 = vor.u32 %v2663_v34, %v2402_v36  ;;  %v2661_v40 = vld [vmem:[#allocation11 + $0x14] sm:$0xf]  ;;  %v2394_v41 = vld [vmem:[#allocation11 + $0x18] sm:$0xf0] }
 0x140   : > { %v2393_v42 = vor.u32 %v2662_v38, %v2392_v37  ;;  %v2397_v43 = vor.u32 %v2661_v40, %v2394_v41  ;;  %v2384_v44 = vld [vmem:[#allocation11] sm:$0xf]  ;;  %v2660_v45 = vld [vmem:[#allocation11 + $0x4] sm:$0xf0]  ;;  %v2659_v46 = vld [vmem:[#allocation11 + $0x4] sm:$0xf] }
 0x141   : > { %v2385_v47 = vor.u32 %v2660_v45, %v2384_v44  ;;  %v2386_v48 = vld [vmem:[#allocation11 + $0x8] sm:$0xf0]  ;;  %v1279_v50 = vld [vmem:[#allocation2 + $0xc] sm:$0xf]  ;;  %v3676_v51 = vld [vmem:[#allocation2 + $0x4] sm:$0xf] }
 0x142   : > { %v2389_v49 = vor.u32 %v2659_v46, %v2386_v48  ;;  %v2374_v52 = vld [vmem:[#allocation11 + $0x70] sm:$0xf]  ;;  %v1418_v53 = vunpack.c.l.b16 %v1279_v50  ;;  %v2674_v54 = vld [vmem:[#allocation11 + $0x74] sm:$0xf0]  ;;  %v2673_v55 = vld [vmem:[#allocation11 + $0x74] sm:$0xf] }
 0x143   : > { %2344 = vmatmul.msk.bf16.vlgmr.msra.gmra.mxu0 %vm1002_vm0, %v999_v56  ;;  %v2376_v56 = vld [vmem:[#allocation11 + $0x78] sm:$0xf0]  ;;  %v2375_v57 = vor.u32 %v2674_v54, %v2374_v52  ;;  %v2366_v59 = vld [vmem:[#allocation11 + $0x60] sm:$0xf]  ;;  %v2672_v60 = vld [vmem:[#allocation11 + $0x64] sm:$0xf0] }
 0x144   : > { %1256 = vmatpush.bf16.msrb.mxu0 %v2409_v19  ;;  %v2379_v58 = vor.u32 %v2673_v55, %v2376_v56  ;;  %v2350_v17 = vld [vmem:[#allocation11 + $0x40] sm:$0xf]  ;;  %v2668_v18 = vld [vmem:[#allocation11 + $0x44] sm:$0xf0]  ;;  %v2667_v19 = vld [vmem:[#allocation11 + $0x44] sm:$0xf] }
 0x145   : > { %1187 = vmatpush.bf16.msrb.mxu1 %v2375_v57  ;;  %v2351_v20 = vor.u32 %v2668_v18, %v2350_v17  ;;  %v2352_v21 = vld [vmem:[#allocation11 + $0x48] sm:$0xf0] }
 0x147   : > { %1068 = vrot.lane.b32.xlu0 %v1067_v61, %s3280_s19  ;;  %v2671_v61 = vld [vmem:[#allocation11 + $0x64] sm:$0xf] }
 0x148   : > { %1257 = vmatpush.bf16.msrb.mxu0 %v2401_v35 }
 0x14c   : > { %1258 = vmatpush.bf16.msrb.mxu0 %v2393_v42 }
 0x150   : > { %1259 = vmatpush.bf16.msrb.mxu0 %v2385_v47 }
 0x199   : > { %v1111_v5 = vpop.permute.xlu2 %1110 }
 0x19a   : > { %v1116_v16 = vsel %vm1039_vm2, %v1111_v5, 0  ;;  %v2669_v5 = vld [vmem:[#allocation11 + $0x54] sm:$0xf] }
 0x19b   : > { %1125 = vmatpush.bf16.msra.mxu3 %v1116_v16 }
 0x19f   : > { %1200 = vmatpush.bf16.msrb.mxu3 %v2379_v58 }
 0x1b1   : > { %v1074_v62 = vpop.permute.xlu0 %1073 }
 0x1b2   : > { %v1079_v63 = vsel %vm1002_vm0, %v1074_v62, 0  ;;  %v1419_v62 = vpack.c.b16 %v1418_v53, %v1418_v53 }
 0x1b3   : > { %1088 = vmatpush.bf16.xpose.msra.mxu2 %v1079_v63  ;;  %v2368_v63 = vld [vmem:[#allocation11 + $0x68] sm:$0xf0] }
 0x1b9   : > { %v1069_v0 = vpop.permute.xlu0 %1068 }
 0x1ba   : > { %2346 = vmatmul.msk.bf16.vlgmr.msra.gmra.mxu2 %vm1002_vm0, %v1069_v0  ;;  %v2367_v0 = vor.u32 %v2672_v60, %v2366_v59  ;;  %v2681_v60 = vld [vmem:[#allocation11 + $0xb4] sm:$0xf] }
 0x1bb   : > { %1269 = vmatpush.bf16.msrb.mxu2 %v2413_v22  ;;  %v2355_v22 = vor.u32 %v2667_v19, %v2352_v21 }
 0x1bc   : > { %1188 = vmatpush.bf16.msrb.mxu1 %v2367_v0  ;;  %v2682_v0 = vld [vmem:[#allocation11 + $0xb4] sm:$0xf0] }
 0x1bf   : > { %1270 = vmatpush.bf16.msrb.mxu2 %v2405_v39 }
 0x1c0   : > { %v1018_v1 = vpop.f32.mrf.mxu0 }
 0x1c1   : > { %v1022_v2 = vmul.f32 0.125, %v1018_v1  ;;  %v2371_v1 = vor.u32 %v2671_v61, %v2368_v63  ;;  %v2446_v61 = vld [vmem:[#allocation11 + $0xb8] sm:$0xf0] }
 0x1c2   : > { %v2449_v63 = vor.u32 %v2681_v60, %v2446_v61 }
 0x1c3   : > { %v1024_v3 = vsel %vm1023_vm1, %v1022_v2, -inf  ;;  %1271 = vmatpush.bf16.msrb.mxu2 %v2397_v43  ;;  %1201 = vmatpush.bf16.msrb.mxu3 %v2371_v1  ;;  %v2679_v1 = vld [vmem:[#allocation11 + $0xa4] sm:$0xf] }
 0x1c4   : > { %1025 = vmax.xlane.f32.xlu2 %v1024_v3  ;;  %v1413_v3 = vunpack.c.l.b16 %v3676_v51 }
 0x1c7   : > { %1272 = vmatpush.bf16.msrb.mxu2 %v2389_v49  ;;  %v1280_v49 = vld [vmem:[#allocation2 + $0x14] sm:$0xf] }
 0x1c8   : > { %v1020_v4 = vpop.f32.mrf.mxu0  ;;  %v1455_v58 = vunpack.c.l.b16 %v1280_v49 }
 0x1c9   : > { %v2670_v4 = vld [vmem:[#allocation11 + $0x54] sm:$0xf0] }
 0x1ca   : > { %v1456_v59 = vpack.c.b16 %v1455_v58, %v1455_v58 }
 0x1cb   : > { %1401 = vmatpush.bf16.msra.mxu2 %v2449_v63 }
 0x237   : > { %v1026_v6 = vpop.xlane.xlu2 %1025 }
 0x238   : > { %v1027_v7 = vsub.f32 %v1022_v2, %v1026_v6  ;;  %v2358_v2 = vld [vmem:[#allocation11 + $0x50] sm:$0xf]  ;;  %v2360_v6 = vld [vmem:[#allocation11 + $0x58] sm:$0xf0] }
 0x23a   : > { %v1028_v8 = vmul.f32 1.442695, %v1027_v7  ;;  %v2359_v7 = vor.u32 %v2670_v4, %v2358_v2  ;;  %v2438_v2 = vld [vmem:[#allocation11 + $0xa8] sm:$0xf0]  ;;  %v2436_v4 = vld [vmem:[#allocation11 + $0xa0] sm:$0xf] }
 0x23c   : > { %2874 = vpow2.f32 %v1028_v8  ;;  %v2363_v8 = vor.u32 %v2669_v5, %v2360_v6  ;;  %1189 = vmatpush.bf16.msrb.mxu1 %v2359_v7  ;;  %v2680_v5 = vld [vmem:[#allocation11 + $0xa4] sm:$0xf0]  ;;  %v2441_v6 = vor.u32 %v2679_v1, %v2438_v2 }
 0x23d   : > { %v1090_v9 = vpop.f32.mrf.mxu2 }
 0x23e   : > { %v1094_v10 = vmul.f32 0.125, %v1090_v9  ;;  %v1414_v9 = vpack.c.b16 %v1413_v3, %v1413_v3  ;;  %1202 = vmatpush.bf16.msrb.mxu3 %v2363_v8  ;;  %v2437_v8 = vor.u32 %v2680_v5, %v2436_v4  ;;  %1402 = vmatpush.bf16.msra.mxu2 %v2441_v6  ;;  %v1558_v6 = vld [vmem:[%s3881_s23] sm:$0x3] }
 0x240   : > { %v1095_v11 = vsel %vm1023_vm1, %v1094_v10, -inf  ;;  %1190 = vmatpush.bf16.msrb.mxu1 %v2351_v20 }
 0x241   : > { %1096 = vmax.xlane.f32.xlu1 %v1095_v11 }
 0x242   : > { %v2875_v12 = vpop.eup %2874  ;;  %1203 = vmatpush.bf16.msrb.mxu3 %v2355_v22 }
 0x243   : > { %v1030_v13 = vsel %vm1023_vm1, %v2875_v12, 0.0 }
 0x244   : > { %1031 = vadd.xlane.f32.xlu0 %v1030_v13 }
 0x245   : > { %v1092_v14 = vpop.f32.mrf.mxu2 }
 0x2b4   : > { %v1097_v23 = vpop.xlane.xlu1 %1096 }
 0x2b5   : > { %v1098_v24 = vsub.f32 %v1094_v10, %v1097_v23  ;;  %v1285_v23 = vsel %vm1002_vm0, %v1279_v50, 0  ;;  %v1317_v50 = vsel %vm1039_vm2, %v1280_v49, 0 }
 0x2b7   : > { %v1099_v25 = vmul.f32 1.442695, %v1098_v24  ;;  %v1032_v26 = vpop.xlane.xlu0 %1031 }
 0x2b8   : > { %2876 = vrcp.f32 %v1032_v26 }
 0x2b9   : > { %2878 = vpow2.f32 %v1099_v25 }
 0x2be   : > { %v2877_v27 = vpop.eup %2876 }
 0x2bf   : > { %v3671_v28 = vpop.eup %2878  ;;  %v1034_v29 = vmul.f32 %v2877_v27, %v2875_v12 }
 0x2c0   : > { %v1101_v30 = vsel %vm1023_vm1, %v3671_v28, 0.0 }
 0x2c1   : > { %1102 = vadd.xlane.f32.xlu1 %v1101_v30  ;;  %v1035_v31 = vpack.c.bf16 %v1034_v29, %v1034_v29 }
 0x2c3   : > { %2345 = vmatmul.msk.bf16.vlgmr.msra.gmra.mxu1 %vm1023_vm1, %v1035_v31 }
 0x2c4   : > { %1294 = vmatpush.bf16.xpose.msra.mxu1 %v1285_v23 }
 0x2da   : > { %1420 = vrot.lane.b32.xlu1 %v1419_v62, %s3280_s19  ;;  %v2444_v62 = vld [vmem:[#allocation11 + $0xb0] sm:$0xf] }
 0x2db   : > { %v2445_v3 = vor.u32 %v2682_v0, %v2444_v62 }
 0x2dd   : > { %1388 = vmatpush.bf16.msra.mxu0 %v2445_v3 }
 0x2e1   : > { %1389 = vmatpush.bf16.msra.mxu0 %v2437_v8 }
 0x2e2   : > { %1415 = vrot.lane.b32.xlu1 %v1414_v9, %s3280_s19  ;;  %v2677_v9 = vld [vmem:[#allocation11 + $0x94] sm:$0xf] }
 0x334   : > { %v1103_v10 = vpop.xlane.xlu1 %1102 }
 0x335   : > { %2880 = vrcp.f32 %v1103_v10  ;;  %v2430_v10 = vld [vmem:[#allocation11 + $0x98] sm:$0xf0] }
 0x33b   : > { %v2881_v11 = vpop.eup %2880 }
 0x33c   : > { %v1105_v12 = vmul.f32 %v2881_v11, %v3671_v28  ;;  %v2428_v11 = vld [vmem:[#allocation11 + $0x90] sm:$0xf] }
 0x33e   : > { %v1106_v13 = vpack.c.bf16 %v1105_v12, %v1105_v12  ;;  %v2678_v12 = vld [vmem:[#allocation11 + $0x94] sm:$0xf0] }
 0x340   : > { %v1052_v14 = vpop.f32.mrf.mxu1  ;;  %2347 = vmatmul.msk.bf16.vlgmr.msra.gmra.mxu3 %vm1023_vm1, %v1106_v13  ;;  %v2433_v13 = vor.u32 %v2677_v9, %v2430_v10  ;;  %v1560_v10 = vperm.slane %v1558_v6, 0 }
 0x341   : > { %v1056_v15 = vpack.c.bf16 %v1052_v14, %v1052_v14  ;;  %1326 = vmatpush.bf16.msra.mxu3 %v1317_v50  ;;  %v2429_v14 = vor.u32 %v2678_v12, %v2428_v11  ;;  %v2686_v50 = vld [vmem:[#allocation11 + $0xd4] sm:$0xf0]  ;;  %v1561_v12 = vperm.slane %v1558_v6, 1 }
 0x342   : > { %1403 = vmatpush.bf16.msra.mxu2 %v2433_v13 }
 0x343   : > { %2414 = vmatmul.msk.bf16.vlgmr.msrb.gmra.mxu0 %vm1002_vm0, %v1056_v15  ;;  %2415 = vmatmul.msk.bf16.vlgmr.msrb.gmra.mxu2 %vm1002_vm0, %v1056_v15  ;;  %v2675_v15 = vld [vmem:[#allocation11 + $0x84] sm:$0xf] }
 0x344   : > { %1390 = vmatpush.bf16.msra.mxu0 %v2429_v14 }
 0x348   : > { %v1054_v16 = vpop.f32.mrf.mxu1 }
 0x349   : > { %v2422_v16 = vld [vmem:[#allocation11 + $0x88] sm:$0xf0] }
 0x34a   : > { %v2425_v18 = vor.u32 %v2675_v15, %v2422_v16 }
 0x34c   : > { %v1421_v25 = vpop.permute.xlu1 %1420  ;;  %1404 = vmatpush.bf16.msra.mxu2 %v2425_v18  ;;  %v998_v18 = vld [vmem:[#allocation5 + $0x8] sm:$0xff] }
 0x34d   : > { %v1426_v28 = vsel %vm1002_vm0, %v1421_v25, 0 }
 0x354   : > { %v1416_v33 = vpop.permute.xlu1 %1415 }
 0x3c0   : > { %v3686_v24 = vpop.f32.mrf.mxu0 }
 0x3c3   : > { %v1127_v26 = vpop.f32.mrf.mxu3 }
 0x3c4   : > { %v1131_v27 = vpack.c.bf16 %v1127_v26, %v1127_v26 }
 0x3c6   : > { %2380 = vmatmul.msk.bf16.vlgmr.msrb.gmra.mxu1 %vm1002_vm0, %v1131_v27  ;;  %2381 = vmatmul.msk.bf16.vlgmr.msrb.gmra.mxu3 %vm1002_vm0, %v1131_v27  ;;  %v3691_v29 = vpop.f32.mrf.mxu2 }
 0x3c7   : > { %1435 = vmatpush.bf16.xpose.msrb.mxu1 %v1426_v28  ;;  %v2420_v28 = vld [vmem:[#allocation11 + $0x80] sm:$0xf] }
 0x3c8   : > { %v1263_v30 = vpop.f32.mrf.mxu0 }
 0x3c9   : > { %v2676_v30 = vld [vmem:[#allocation11 + $0x84] sm:$0xf0] }
 0x3cb   : > { %v1129_v31 = vpop.f32.mrf.mxu3 }
 0x3cc   : > { %v2421_v31 = vor.u32 %v2676_v30, %v2420_v28 }
 0x3ce   : > { %v1276_v32 = vpop.f32.mrf.mxu2  ;;  %1391 = vmatpush.bf16.msra.mxu0 %v2421_v31 }
 0x3cf   : > { %v2689_v32 = vld [vmem:[#allocation11 + $0xf4] sm:$0xf] }
 0x3d6   : > { %2416 = vmatmul.msk.bf16.vlgmr.msra.gmra.mxu1 %vm1002_vm0, %v3676_v51 }
 0x3e6   : > { %2452 = vmatmul.msk.bf16.vlgmr.msrb.gmra.mxu1 %vm1002_vm0, %v1416_v33  ;;  %v2482_v33 = vld [vmem:[#allocation11 + $0xf8] sm:$0xf0] }
 0x443   : > { %v3696_v34 = vpop.f32.mrf.mxu1 }
 0x444   : > { %v1262_v4 = vadd.f32 %v3686_v24, %v3696_v34 }
 0x449   : > { %v3698_v35 = vpop.f32.mrf.mxu3 }
 0x44a   : > { %v1275_v8 = vadd.f32 %v3691_v29, %v3698_v35 }
 0x44b   : > { %v1194_v36 = vpop.f32.mrf.mxu1 }
 0x44c   : > { %v2480_v36 = vld [vmem:[#allocation11 + $0xf0] sm:$0xf] }
 0x451   : > { %v1207_v37 = vpop.f32.mrf.mxu3 }
 0x452   : > { %v2485_v37 = vor.u32 %v2689_v32, %v2482_v33 }
 0x453   : > { %v1296_v38 = vpop.f32.mrf.mxu1 }
 0x454   : > { %v1300_v39 = vmul.f32 0.125, %v1296_v38  ;;  %v2690_v38 = vld [vmem:[#allocation11 + $0xf4] sm:$0xf0]  ;;  %1547 = vmatpush.bf16.msrb.mxu2 %v2485_v37 }
 0x456   : > { %v1301_v40 = vsel %vm1023_vm1, %v1300_v39, -inf }
 0x457   : > { %1302 = vmax.xlane.f32.xlu1 %v1301_v40  ;;  %v2687_v40 = vld [vmem:[#allocation11 + $0xe4] sm:$0xf] }
 0x45b   : > { %v1298_v41 = vpop.f32.mrf.mxu1 }
 0x45c   : > { %v2474_v41 = vld [vmem:[#allocation11 + $0xe8] sm:$0xf0] }
 0x463   : > { %v1437_v42 = vpop.f32.mrf.mxu1 }
 0x464   : > { %v1441_v43 = vmul.f32 0.125, %v1437_v42  ;;  %v2477_v42 = vor.u32 %v2687_v40, %v2474_v41 }
 0x466   : > { %v1442_v44 = vsel %vm1023_vm1, %v1441_v43, -inf  ;;  %1548 = vmatpush.bf16.msrb.mxu2 %v2477_v42 }
 0x467   : > { %1443 = vmax.xlane.f32.xlu2 %v1442_v44  ;;  %v2688_v44 = vld [vmem:[#allocation11 + $0xe4] sm:$0xf0] }
 0x46b   : > { %v1439_v45 = vpop.f32.mrf.mxu1 }
 0x4ca   : > { %v1303_v46 = vpop.xlane.xlu1 %1302 }
 0x4cb   : > { %v1304_v47 = vsub.f32 %v1300_v39, %v1303_v46  ;;  %v2481_v39 = vor.u32 %v2690_v38, %v2480_v36  ;;  %v2685_v46 = vld [vmem:[#allocation11 + $0xd4] sm:$0xf]  ;;  %v3282_v38 = vmov 0.0  }
 0x4cc   : > { %1618 = vst [vmem:[#allocation4 + $0x8] sm:$0xff] %v3282_v38 }
 0x4cd   : > { %v1305_v48 = vmul.f32 1.442695, %v1304_v47  ;;  %1534 = vmatpush.bf16.msrb.mxu0 %v2481_v39  ;;  %v2466_v47 = vld [vmem:[#allocation11 + $0xd8] sm:$0xf0]  ;;  %1619 = vst [vmem:[#allocation4] sm:$0xff] %v3282_v38 }
 0x4ce   : > { %v2469_v49 = vor.u32 %v2685_v46, %v2466_v47  ;;  %v1568_v46 = vld [vmem:[%s3882_s30] sm:$0x3] }
 0x4cf   : > { %2882 = vpow2.f32 %v1305_v48  ;;  %v2464_v48 = vld [vmem:[#allocation11 + $0xd0] sm:$0xf] }
 0x4d0   : > { %1549 = vmatpush.bf16.msrb.mxu2 %v2469_v49 }
 0x4d5   : > { %v2883_v51 = vpop.eup %2882 }
 0x4d6   : > { %v1307_v52 = vsel %vm1023_vm1, %v2883_v51, 0.0 }
 0x4d7   : > { %1308 = vadd.xlane.f32.xlu2 %v1307_v52  ;;  %v2458_v52 = vld [vmem:[#allocation11 + $0xc8] sm:$0xf0] }
 0x4da   : > { %v1444_v53 = vpop.xlane.xlu2 %1443 }
 0x4db   : > { %v1445_v54 = vsub.f32 %v1441_v43, %v1444_v53  ;;  %v2472_v43 = vld [vmem:[#allocation11 + $0xe0] sm:$0xf]  ;;  %v2465_v53 = vor.u32 %v2686_v50, %v2464_v48  ;;  %v1603_v50 = vperm.slane %v1568_v46, 0 }
 0x4dc   : > { %v2473_v45 = vor.u32 %v2688_v44, %v2472_v43  ;;  %v1569_v48 = vld [vmem:[#allocation15] sm:$0x3] }
 0x4dd   : > { %v1446_v55 = vmul.f32 1.442695, %v1445_v54 }
 0x4de   : > { %1535 = vmatpush.bf16.msrb.mxu0 %v2473_v45 }
 0x4df   : > { %2884 = vpow2.f32 %v1446_v55  ;;  %v2456_v55 = vld [vmem:[#allocation11 + $0xc0] sm:$0xf] }
 0x4e2   : > { %1536 = vmatpush.bf16.msrb.mxu0 %v2465_v53  ;;  %v1610_v53 = vperm.slane %v1569_v48, 0 }
 0x4e5   : > { %v2885_v56 = vpop.eup %2884 }
 0x4e6   : > { %v1448_v57 = vsel %vm1023_vm1, %v2885_v56, 0.0 }
 0x4e7   : > { %1449 = vadd.xlane.f32.xlu0 %v1448_v57 }
 0x4ef   : > { %1457 = vrot.lane.b32.xlu2 %v1456_v59, %s3280_s19 }
 0x54a   : > { %v1309_v7 = vpop.xlane.xlu2 %1308 }
 0x54b   : > { %2886 = vrcp.f32 %v1309_v7 }
 0x551   : > { %v2887_v17 = vpop.eup %2886 }
 0x552   : > { %v1311_v19 = vmul.f32 %v2887_v17, %v2883_v51  ;;  %v1458_v20 = vpop.permute.xlu2 %1457  ;;  %v2683_v51 = vld [vmem:[#allocation11 + $0xc4] sm:$0xf]  ;;  %v997_v17 = vld [vmem:[#allocation5] sm:$0xff] }
 0x553   : > { %v1463_v21 = vsel %vm1039_vm2, %v1458_v20, 0  ;;  %v2461_v54 = vor.u32 %v2683_v51, %v2458_v52  ;;  %v1604_v51 = vperm.slane %v1568_v46, 1 }
 0x554   : > { %v1312_v22 = vpack.c.bf16 %v1311_v19, %v1311_v19  ;;  %1472 = vmatpush.bf16.msrb.mxu3 %v1463_v21 }
 0x555   : > { %1550 = vmatpush.bf16.msrb.mxu2 %v2461_v54  ;;  %v1611_v54 = vperm.slane %v1569_v48, 1 }
 0x556   : > { %2417 = vmatmul.msk.bf16.vlgmr.msra.gmra.mxu3 %vm1023_vm1, %v1312_v22  ;;  %v3281_v22 = vmov 256.0  }
 0x55a   : > { %v1450_v23 = vpop.xlane.xlu0 %1449 }
 0x55b   : > { %2888 = vrcp.f32 %v1450_v23 }
 0x55c   : > { %2890 = vrcp.f32 %v3281_v22 }
 0x561   : > { %v2889_v25 = vpop.eup %2888 }
 0x562   : > { %v1452_v26 = vmul.f32 %v2889_v25, %v2885_v56  ;;  %v2684_v56 = vld [vmem:[#allocation11 + $0xc4] sm:$0xf0]  ;;  %v2891_v23 = vpop.eup %2890 }
 0x563   : > { %v2457_v57 = vor.u32 %v2684_v56, %v2456_v55  ;;  %v1574_v29 = vmul.f32 256.0, %v2891_v23  ;;  %vm1578_vm3 = vweird.f32 %v2891_v23 }
 0x564   : > { %v1453_v27 = vpack.c.bf16 %v1452_v26, %v1452_v26 }
 0x565   : > { %1537 = vmatpush.bf16.msrb.mxu0 %v2457_v57  ;;  %v1575_v35 = vsub.f32 1.0, %v1574_v29 }
 0x566   : > { %2453 = vmatmul.msk.bf16.vlgmr.msrb.gmra.mxu3 %vm1023_vm1, %v1453_v27 }
 0x567   : > { %v1576_v25 = vmul.f32 %v2891_v23, %v1575_v35 }
 0x569   : > { %v1577_v26 = vadd.f32 %v2891_v23, %v1576_v25 }
 0x56b   : > { %v1579_v27 = vsel %vm1578_vm3, %v2891_v23, %v1577_v26 }
 0x5d9   : > { %v1328_v58 = vpop.f32.mrf.mxu3 }
 0x5da   : > { %v1332_v59 = vpack.c.bf16 %v1328_v58, %v1328_v58 }
 0x5dc   : > { %2450 = vmatmul.msk.bf16.vlgmr.msra.gmra.mxu0 %vm1002_vm0, %v1332_v59  ;;  %2451 = vmatmul.msk.bf16.vlgmr.msra.gmra.mxu2 %vm1002_vm0, %v1332_v59 }
 0x5e1   : > { %v1330_v60 = vpop.f32.mrf.mxu3 }
 0x5e9   : > { %v1474_v61 = vpop.f32.mrf.mxu3 }
 0x5ea   : > { %v1478_v62 = vpack.c.bf16 %v1474_v61, %v1474_v61 }
 0x5ec   : > { %2486 = vmatmul.msk.bf16.vlgmr.msrb.gmra.mxu0 %vm1002_vm0, %v1478_v62  ;;  %2487 = vmatmul.msk.bf16.vlgmr.msrb.gmra.mxu2 %vm1002_vm0, %v1478_v62 }
 0x5f1   : > { %v1476_v63 = vpop.f32.mrf.mxu3 }
 0x659   : > { %v1393_v0 = vpop.f32.mrf.mxu0 }
 0x65a   : > { %v1410_v7 = vadd.f32 %v1393_v0, %v1262_v4 }
 0x65f   : > { %v1406_v1 = vpop.f32.mrf.mxu2 }
 0x660   : > { %v1411_v11 = vadd.f32 %v1406_v1, %v1275_v8 }
 0x661   : > { %v1395_v2 = vpop.f32.mrf.mxu0 }
 0x667   : > { %v1408_v3 = vpop.f32.mrf.mxu2 }
 0x669   : > { %v1539_v5 = vpop.f32.mrf.mxu0 }
 0x66a   : > { %v1556_v9 = vadd.f32 %v1539_v5, %v1410_v7 }
 0x66c   : > { %v1564_v14 = vadd.f32 %v1560_v10, %v1556_v9 }
 0x66e   : > { %v1566_v34 = vadd.f32 %v1564_v14, %v997_v17 }
 0x66f   : > { %v1552_v13 = vpop.f32.mrf.mxu2 }
 0x670   : > { %v1557_v15 = vadd.f32 %v1552_v13, %v1411_v11 }
 0x671   : > { %v1541_v16 = vpop.f32.mrf.mxu0 }
 0x672   : > { %v1565_v24 = vadd.f32 %v1561_v12, %v1557_v15 }
 0x674   : > { %v1567_v19 = vadd.f32 %v1565_v24, %v998_v18 }
 0x676   : > { %v1570_v20 = vadd.f32 %v1567_v19, %v1566_v34 }
 0x677   : > { %v1554_v21 = vpop.f32.mrf.mxu2 }
 0x678   : > { %1571 = vadd.xlane.f32.xlu0 %v1570_v20 }
 0x6eb   : > { %v1572_v28 = vpop.xlane.xlu0 %1571 }
 0x6ec   : > { %v1580_v30 = vmul.f32 %v1579_v27, %v1572_v28 }
 0x6ee   : > { %v1581_v31 = vsub.f32 %v1566_v34, %v1580_v30  ;;  %v1582_v32 = vsub.f32 %v1567_v19, %v1580_v30 }
 0x6f0   : > { %v1583_v33 = vmul.f32 %v1581_v31, %v1581_v31  ;;  %v1584_v36 = vmul.f32 %v1582_v32, %v1582_v32 }
 0x6f2   : > { %v1585_v37 = vadd.f32 %v1584_v36, %v1583_v33 }
 0x6f4   : > { %1586 = vadd.xlane.f32.xlu0 %v1585_v37 }
 0x767   : > { %v1587_v39 = vpop.xlane.xlu0 %1586 }
 0x768   : > { %v1588_v40 = vmul.f32 %v1587_v39, %v1579_v27 }
 0x76a   : > { %v1589_v41 = vadd.f32 1e-05, %v1588_v40 }
 0x76c   : > { %2892 = vrsqrt.f32 %v1589_v41  ;;  %vm1596_vm5 = vweird.f32 %v1589_v41 }
 0x772   : > { %v2893_v42 = vpop.eup %2892 }
 0x773   : > { %v1591_v43 = vmul.f32 %v2893_v42, %v1589_v41  ;;  %vm1597_vm4 = vweird.f32 %v2893_v42 }
 0x774   : > { %vm1598_vm6 = vmor %vm1596_vm5, %vm1597_vm4 }
 0x775   : > { %v1592_v44 = vmul.f32 %v2893_v42, %v1591_v43 }
 0x777   : > { %v1593_v45 = vmul.f32 0.5, %v1592_v44 }
 0x779   : > { %v1594_v47 = vsub.f32 1.5, %v1593_v45 }
 0x77b   : > { %v1595_v49 = vmul.f32 %v2893_v42, %v1594_v47 }
 0x77d   : > { %v1599_v52 = vsel %vm1598_vm6, %v2893_v42, %v1595_v49 }
 0x77e   : > { %v1600_v55 = vmul.f32 %v1599_v52, %v1581_v31  ;;  %v1601_v56 = vmul.f32 %v1599_v52, %v1582_v32 }
 0x780   : > { %v1607_v57 = vmul.f32 %v1603_v50, %v1600_v55  ;;  %v1608_v58 = vmul.f32 %v1604_v51, %v1601_v56 }
 0x782   : > { %v1614_v59 = vadd.f32 %v1610_v53, %v1607_v57  ;;  %v1615_v60 = vadd.f32 %v1611_v54, %v1608_v58 }
 0x784   : > { %1616 = vst [vmem:[#allocation3] sm:$0xff] %v1614_v59 }
 0x785   : > { %1617 = vst [vmem:[#allocation3 + $0x8] sm:$0xff] %v1615_v60 }
 0x786 PF: > { %s3883_s22 = sld [smem:[#allocation29_spill]] }
 0x78c   : > { %p2488_p1 = scmp.lt.s32.totalorder %s3883_s22, 3 }
 0x78e   : > { %1623 = sbr.rel (%p2488_p1) target bundleno = 2245 (0x8c5), region = 116 }
 0x793   : > { %v2698_v61 = vld [vmem:[%s3563_s8 + $0x38] sm:$0xff]  ;;  %v2697_v63 = vld [vmem:[%s3563_s8 + $0x30] sm:$0xff]  ;;  %v2696_v1 = vld [vmem:[%s3563_s8 + $0x28] sm:$0xff] }
 0x794   : > { %v2706_v62 = vld [vmem:[%s3563_s8 + $0x78] sm:$0xff]  ;;  %1760 = vmatpush.bf16.msra.mxu0 %v2698_v61  ;;  %v2705_v0 = vld [vmem:[%s3563_s8 + $0x70] sm:$0xff]  ;;  %v2704_v2 = vld [vmem:[%s3563_s8 + $0x68] sm:$0xff] }
 0x795   : > { %1773 = vmatpush.bf16.msra.mxu1 %v2706_v62  ;;  %v2611_v3 = vld [vmem:[%s3569_s14 + $0x70] sm:$0xf]  ;;  %v2722_v4 = vld [vmem:[%s3569_s14 + $0x74] sm:$0xf0]  ;;  %v2721_v5 = vld [vmem:[%s3569_s14 + $0x74] sm:$0xf] }
 0x796   : > { %v2612_v6 = vor.u32 %v2722_v4, %v2611_v3  ;;  %v2613_v7 = vld [vmem:[%s3569_s14 + $0x78] sm:$0xf0]  ;;  %v2603_v8 = vld [vmem:[%s3569_s14 + $0x60] sm:$0xf]  ;;  %v2720_v9 = vld [vmem:[%s3569_s14 + $0x64] sm:$0xf0] }
 0x797   : > { %v2616_v10 = vor.u32 %v2721_v5, %v2613_v7  ;;  %v2719_v11 = vld [vmem:[%s3569_s14 + $0x64] sm:$0xf]  ;;  %v2605_v12 = vld [vmem:[%s3569_s14 + $0x68] sm:$0xf0]  ;;  %v2604_v14 = vor.u32 %v2720_v9, %v2603_v8  ;;  %v2595_v16 = vld [vmem:[%s3569_s14 + $0x50] sm:$0xf] }
 0x798   : > { %1761 = vmatpush.bf16.msra.mxu0 %v2697_v63  ;;  %v2695_v13 = vld [vmem:[%s3563_s8 + $0x20] sm:$0xff]  ;;  %1886 = vmatpush.bf16.msra.mxu2 %v2612_v6  ;;  %v2718_v17 = vld [vmem:[%s3569_s14 + $0x54] sm:$0xf0]  ;;  %v2608_v18 = vor.u32 %v2719_v11, %v2605_v12  ;;  %v2717_v24 = vld [vmem:[%s3569_s14 + $0x54] sm:$0xf] }
 0x799   : > { %1774 = vmatpush.bf16.msra.mxu1 %v2705_v0  ;;  %v2703_v15 = vld [vmem:[%s3563_s8 + $0x60] sm:$0xff]  ;;  %1899 = vmatpush.bf16.msra.mxu3 %v2616_v10  ;;  %v2597_v34 = vld [vmem:[%s3569_s14 + $0x58] sm:$0xf0]  ;;  %v2596_v21 = vor.u32 %v2718_v17, %v2595_v16  ;;  %v2716_v23 = vld [vmem:[%s3569_s14 + $0x44] sm:$0xf0] }
 0x79a   : > { %v2694_v19 = vld [vmem:[%s3563_s8 + $0x18] sm:$0xff]  ;;  %v2587_v22 = vld [vmem:[%s3569_s14 + $0x40] sm:$0xf]  ;;  %v2600_v29 = vor.u32 %v2717_v24, %v2597_v34  ;;  %v2715_v35 = vld [vmem:[%s3569_s14 + $0x44] sm:$0xf] }
 0x79b   : > { %v2702_v20 = vld [vmem:[%s3563_s8 + $0x58] sm:$0xff]  ;;  %v2589_v25 = vld [vmem:[%s3569_s14 + $0x48] sm:$0xf0]  ;;  %v2693_v26 = vld [vmem:[%s3563_s8 + $0x10] sm:$0xff]  ;;  %v2588_v27 = vor.u32 %v2716_v23, %v2587_v22 }
 0x79c   : > { %1762 = vmatpush.bf16.msra.mxu0 %v2696_v1  ;;  %1887 = vmatpush.bf16.msra.mxu2 %v2604_v14  ;;  %v2701_v28 = vld [vmem:[%s3563_s8 + $0x50] sm:$0xff]  ;;  %v2714_v31 = vld [vmem:[%s3569_s14 + $0x34] sm:$0xf0]  ;;  %v2592_v32 = vor.u32 %v2715_v35, %v2589_v25  ;;  %v2581_v36 = vld [vmem:[%s3569_s14 + $0x38] sm:$0xf0] }
 0x79d   : > { %1775 = vmatpush.bf16.msra.mxu1 %v2704_v2  ;;  %1900 = vmatpush.bf16.msra.mxu3 %v2608_v18  ;;  %v2579_v30 = vld [vmem:[%s3569_s14 + $0x30] sm:$0xf]  ;;  %v2713_v33 = vld [vmem:[%s3569_s14 + $0x34] sm:$0xf]  ;;  %v2692_v37 = vld [vmem:[%s3563_s8 + $0x8] sm:$0xff] }
 0x79e   : > { %v2580_v38 = vor.u32 %v2714_v31, %v2579_v30  ;;  %v2700_v39 = vld [vmem:[%s3563_s8 + $0x48] sm:$0xff]  ;;  %v2571_v40 = vld [vmem:[%s3569_s14 + $0x20] sm:$0xf]  ;;  %v2584_v42 = vor.u32 %v2713_v33, %v2581_v36  ;;  %v2711_v43 = vld [vmem:[%s3569_s14 + $0x24] sm:$0xf] }
 0x79f   : > { %v2712_v41 = vld [vmem:[%s3569_s14 + $0x24] sm:$0xf0]  ;;  %v2573_v44 = vld [vmem:[%s3569_s14 + $0x28] sm:$0xf0]  ;;  %v2691_v45 = vld [vmem:[%s3563_s8] sm:$0xff] }
 0x7a0   : > { %1763 = vmatpush.bf16.msra.mxu0 %v2695_v13  ;;  %1888 = vmatpush.bf16.msra.mxu2 %v2596_v21  ;;  %v2572_v46 = vor.u32 %v2712_v41, %v2571_v40  ;;  %v2699_v47 = vld [vmem:[%s3563_s8 + $0x40] sm:$0xff]  ;;  %v1624_v48 = vld [vmem:[#allocation3] sm:$0xff]  ;;  %v1625_v49 = vld [vmem:[#allocation3 + $0x8] sm:$0xff]  ;;  %v2576_v50 = vor.u32 %v2711_v43, %v2573_v44 }
 0x7a1   : > { %1776 = vmatpush.bf16.msra.mxu1 %v2703_v15  ;;  %1901 = vmatpush.bf16.msra.mxu3 %v2600_v29  ;;  %v1626_v51 = vpack.c.bf16 %v1624_v48, %v1624_v48  ;;  %v1627_v52 = vpack.c.bf16 %v1625_v49, %v1625_v49  ;;  %v2563_v53 = vld [vmem:[%s3569_s14 + $0x10] sm:$0xf]  ;;  %v2710_v54 = vld [vmem:[%s3569_s14 + $0x14] sm:$0xf0]  ;;  %v2709_v55 = vld [vmem:[%s3569_s14 + $0x14] sm:$0xf] }
 0x7a2   : > { %v2564_v56 = vor.u32 %v2710_v54, %v2563_v53  ;;  %v2565_v57 = vld [vmem:[%s3569_s14 + $0x18] sm:$0xf0]  ;;  %v2555_v59 = vld [vmem:[%s3569_s14] sm:$0xf]  ;;  %v2708_v60 = vld [vmem:[%s3569_s14 + $0x4] sm:$0xf0] }
 0x7a3   : > { %v2568_v58 = vor.u32 %v2709_v55, %v2565_v57  ;;  %v2707_v61 = vld [vmem:[%s3569_s14 + $0x4] sm:$0xf]  ;;  %v2556_v62 = vor.u32 %v2708_v60, %v2555_v59  ;;  %v2557_v63 = vld [vmem:[%s3569_s14 + $0x8] sm:$0xf0]  ;;  %v2894_v1 = vld [vmem:[%s719_s25] ss:$0 sm:$0xff] }
 0x7a4   : > { %1764 = vmatpush.bf16.msra.mxu0 %v2694_v19  ;;  %1889 = vmatpush.bf16.msra.mxu2 %v2588_v27  ;;  %v2560_v0 = vor.u32 %v2707_v61, %v2557_v63  ;;  %v1787_v10 = vld [vmem:[#allocation4 + $0x8] sm:$0xff]  ;;  %v1788_v11 = vld [vmem:[#allocation4] sm:$0xff] }
 0x7a5   : > { %1777 = vmatpush.bf16.msra.mxu1 %v2702_v20  ;;  %1902 = vmatpush.bf16.msra.mxu3 %v2592_v32 }
 0x7a8   : > { %1765 = vmatpush.bf16.msra.mxu0 %v2693_v26  ;;  %1890 = vmatpush.bf16.msra.mxu2 %v2580_v38 }
 0x7a9   : > { %1778 = vmatpush.bf16.msra.mxu1 %v2701_v28  ;;  %1903 = vmatpush.bf16.msra.mxu3 %v2584_v42 }
 0x7ac   : > { %1766 = vmatpush.bf16.msra.mxu0 %v2692_v37  ;;  %1891 = vmatpush.bf16.msra.mxu2 %v2572_v46 }
 0x7ad   : > { %1779 = vmatpush.bf16.msra.mxu1 %v2700_v39  ;;  %1904 = vmatpush.bf16.msra.mxu3 %v2576_v50 }
 0x7b0   : > { %1767 = vmatpush.bf16.msra.mxu0 %v2691_v45  ;;  %1892 = vmatpush.bf16.msra.mxu2 %v2564_v56 }
 0x7b1   : > { %1780 = vmatpush.bf16.msra.mxu1 %v2699_v47  ;;  %1905 = vmatpush.bf16.msra.mxu3 %v2568_v58 }
 0x7b3   : > { %1768 = vmatmul.bf16.vlgmr.msra.gmra.mxu0 %v1626_v51 }
 0x7b4   : > { %1781 = vmatmul.bf16.vlgmr.msra.gmra.mxu1 %v1627_v52  ;;  %1893 = vmatpush.bf16.msra.mxu2 %v2556_v62 }
 0x7b5   : > { %1906 = vmatpush.bf16.msra.mxu3 %v2560_v0 }
 0x830   : > { %v1769_v2 = vpop.f32.mrf.mxu0 }
 0x831   : > { %v1782_v3 = vpop.f32.mrf.mxu1  ;;  %v1770_v4 = vadd.f32 %v2894_v1, %v1769_v2 }
 0x833   : > { %v1783_v5 = vadd.f32 %v1782_v3, %v1770_v4 }
 0x835   : > { %v1786_v6 = vmax.f32 %v1783_v5, 0.0 }
 0x837   : > { %v1789_v7 = vpack.c.bf16 %v1786_v6, %v1786_v6 }
 0x838   : > { %v1771_v8 = vpop.f32.mrf.mxu0 }
 0x839   : > { %v1784_v9 = vpop.f32.mrf.mxu1  ;;  %1894 = vmatmul.bf16.vlgmr.msra.gmra.mxu2 %v1789_v7  ;;  %1907 = vmatmul.bf16.vlgmr.msra.gmra.mxu3 %v1789_v7 }
 0x8bc   : > { %v1895_v12 = vpop.f32.mrf.mxu2  ;;  %v1908_v13 = vpop.f32.mrf.mxu3 }
 0x8bd   : > { %v1912_v14 = vadd.f32 %v1895_v12, %v1787_v10  ;;  %v1913_v15 = vadd.f32 %v1908_v13, %v1788_v11 }
 0x8bf   : > { %1914 = vst [vmem:[#allocation4 + $0x8] sm:$0xff] %v1912_v14 }
 0x8c0   : > { %1915 = vst [vmem:[#allocation4] sm:$0xff] %v1913_v15 }
 0x8c4   : > { %v1897_v16 = vpop.f32.mrf.mxu2  ;;  %v1910_v17 = vpop.f32.mrf.mxu3 }
 0x8c5 PF: > { %s3885_s14 = sld [smem:[#allocation29_spill]] }
 0x8cb   : > { %p2617_p2 = scmp.ne.s32.totalorder %s3885_s14, 4 }
 0x8cc   : > { %s3886_s25 = sld [smem:[#allocation39_spill]] (!%p2617_p2) }
 0x8cd   : > { %1919 = sbr.rel (%p2617_p2) target bundleno = 2537 (0x9e9), region = 120  ;;  %s3887_s10 = sld [smem:[#allocation42_spill]] (!%p2617_p2) }
 0x8d2   : > { %v1920_v18 = vld [vmem:[#allocation4 + $0x8] sm:$0xff]  ;;  %v1921_v24 = vld [vmem:[#allocation4] sm:$0xff]  ;;  %v1922_v34 = vld [vmem:[%s3886_s25] sm:$0x3]  ;;  %v3283_v27 = vmov 256.0  }
 0x8d3   : > { %v1924_v19 = vperm.slane %v1922_v34, 0  ;;  %v1925_v20 = vperm.slane %v1922_v34, 1  ;;  %v1930_v21 = vld [vmem:[#allocation3] sm:$0xff]  ;;  %v1931_v22 = vld [vmem:[#allocation3 + $0x8] sm:$0xff]  ;;  %2895 = vrcp.f32 %v3283_v27  ;;  %v1935_v53 = vld [vmem:[#allocation16] sm:$0x3] }
 0x8d4   : > { %v1934_v51 = vld [vmem:[%s3887_s10] sm:$0x3]  ;;  %v1976_v58 = vperm.slane %v1935_v53, 0  ;;  %v1977_v59 = vperm.slane %v1935_v53, 1 }
 0x8d5   : > { %v1928_v23 = vadd.f32 %v1924_v19, %v1920_v18  ;;  %v1929_v29 = vadd.f32 %v1925_v20, %v1921_v24  ;;  %v1969_v55 = vperm.slane %v1934_v51, 0  ;;  %v1970_v56 = vperm.slane %v1934_v51, 1 }
 0x8d7   : > { %v1932_v35 = vadd.f32 %v1930_v21, %v1928_v23  ;;  %v1933_v25 = vadd.f32 %v1931_v22, %v1929_v29 }
 0x8d9   : > { %v1936_v26 = vadd.f32 %v1933_v25, %v1932_v35  ;;  %v2896_v28 = vpop.eup %2895 }
 0x8da   : > { %v1940_v30 = vmul.f32 256.0, %v2896_v28  ;;  %vm1944_vm7 = vweird.f32 %v2896_v28 }
 0x8db   : > { %1937 = vadd.xlane.f32.xlu0 %v1936_v26 }
 0x8dc   : > { %v1941_v31 = vsub.f32 1.0, %v1940_v30 }
 0x8de   : > { %v1942_v32 = vmul.f32 %v2896_v28, %v1941_v31 }
 0x8e0   : > { %v1943_v33 = vadd.f32 %v2896_v28, %v1942_v32 }
 0x8e2   : > { %v1945_v36 = vsel %vm1944_vm7, %v2896_v28, %v1943_v33 }
 0x94e   : > { %v1938_v37 = vpop.xlane.xlu0 %1937 }
 0x94f   : > { %v1946_v38 = vmul.f32 %v1945_v36, %v1938_v37 }
 0x951   : > { %v1947_v39 = vsub.f32 %v1932_v35, %v1946_v38  ;;  %v1948_v40 = vsub.f32 %v1933_v25, %v1946_v38 }
 0x953   : > { %v1949_v41 = vmul.f32 %v1947_v39, %v1947_v39  ;;  %v1950_v42 = vmul.f32 %v1948_v40, %v1948_v40 }
 0x955   : > { %v1951_v43 = vadd.f32 %v1950_v42, %v1949_v41 }
 0x957   : > { %1952 = vadd.xlane.f32.xlu0 %v1951_v43 }
 0x9ca   : > { %v1953_v44 = vpop.xlane.xlu0 %1952 }
 0x9cb   : > { %v1954_v45 = vmul.f32 %v1953_v44, %v1945_v36 }
 0x9cd   : > { %v1955_v46 = vadd.f32 1e-05, %v1954_v45 }
 0x9cf   : > { %2897 = vrsqrt.f32 %v1955_v46  ;;  %vm1962_vm9 = vweird.f32 %v1955_v46 }
 0x9d5   : > { %v2898_v47 = vpop.eup %2897 }
 0x9d6   : > { %v1957_v48 = vmul.f32 %v2898_v47, %v1955_v46  ;;  %vm1963_vm8 = vweird.f32 %v2898_v47 }
 0x9d7   : > { %vm1964_vm10 = vmor %vm1962_vm9, %vm1963_vm8 }
 0x9d8   : > { %v1958_v49 = vmul.f32 %v2898_v47, %v1957_v48 }
 0x9da   : > { %v1959_v50 = vmul.f32 0.5, %v1958_v49 }
 0x9dc   : > { %v1960_v52 = vsub.f32 1.5, %v1959_v50 }
 0x9de   : > { %v1961_v54 = vmul.f32 %v2898_v47, %v1960_v52 }
 0x9e0   : > { %v1965_v57 = vsel %vm1964_vm10, %v2898_v47, %v1961_v54 }
 0x9e1   : > { %v1966_v60 = vmul.f32 %v1965_v57, %v1947_v39  ;;  %v1967_v61 = vmul.f32 %v1965_v57, %v1948_v40 }
 0x9e3   : > { %v1973_v62 = vmul.f32 %v1969_v55, %v1966_v60  ;;  %v1974_v63 = vmul.f32 %v1970_v56, %v1967_v61 }
 0x9e5   : > { %v1980_v0 = vadd.f32 %v1976_v58, %v1973_v62  ;;  %v1981_v1 = vadd.f32 %v1977_v59, %v1974_v63 }
 0x9e7   : > { %1982 = vst [vmem:[#allocation18] sm:$0xff] %v1980_v0 }
 0x9e8   : > { %1983 = vst [vmem:[#allocation18 + $0x8] sm:$0xff] %v1981_v1 }
 0x9e9 PF: > { %p2786_p4 = scmp.eq.s32.totalorder %s3450_s6, 4  ;;  %s3888_s29 = sld [smem:[#allocation43_spill]] }
 0x9ea   : > { %s3284_s24 = smov [#allocation18]  }
 0x9eb   : > { %s1993_s20 = sshll.u32 %s3284_s24, 4  ;;  %s1994_s20 = int_to_ptr.vmem [resolvable:$true] %s1993_s20 }
 0x9ef   : > { %s1995_s19 = sshll.u32 %s3888_s29, 4  ;;  %s1996_s19 = int_to_ptr.hbm [resolvable:$true] %s1995_s19 }
 0x9f0   : > { %2748 = dma.vmem_to_hbm [thread:$0]  (%p2786_p4), %s1994_s20, 256, %s1996_s19, [#allocation7]  }
 0x9f1   : > { %3232 = dma.done.wait (%p2786_p4), [#allocation7], 256  }
 0x9f2   : > { %3234 = vsyncadd (%p2786_p4), [#allocation7], 4294967040 }
 0x9f3 PF: > { %s30_s16 = sadd.s32 1, %s3269_s16   ;;  %s3889_s28 = sld [smem:[#allocation27_spill]] }
 0x9f4   : > { %p27_p5 = scmp.ge.s32.totalorder %s30_s16, 7   ;;  %s3890_s29 = sld [smem:[#allocation28_spill]] }
 0x9f5   : > { %s3891_s30 = sld [smem:[#allocation30_spill]]  ;;  %s3892_s25 = smov %s3241_s26 }
 0x9f6   : > { %s3893_s26 = smov %s3245_s27  ;;  %s3894_s27 = smov %s3524_s11 }
 0x9f7   : > { %s3895_s14 = smov %s3265_s15  ;;  %s3896_s15 = smov %s3898_s17 }
 0x9f8   :  { %29 = sbr.rel (!%p27_p5) target bundleno = 22 (0x16), region = 181 }
 0x9fd   :  { %2009 = vsyncpa [#allocation6], 1 }
 0x9fe   :  { %2011 = vsyncpa [#allocation6 + $0x1], 1 }
 0x9ff   :  { %2012 = vsyncpa [#allocation9], 1 }
 0xa00   :  { %2014 = vsyncpa [#allocation9 + $0x1], 1 }
 0xa01   :  { %2015 = vsyncpa [#allocation12], 1 }
 0xa02   :  { %2016 = vsyncpa [#allocation17], 1 }
 0xa03   :  { %2017 = vsyncpa [#allocation7], 1 }
 0xa04   :  { %2019 = vsyncpa [#allocation7 + $0x1], 1 }

</bundles_post_ra>
